<compile_context>
chip_gen: v6e
topology: v6e:2x2x1
jax: 0.10.0
libtpu: 0.0.40
codegen_flags: <defaults>
</compile_context>

<pallas_src>
import math
import numpy as np

import jax
import jax.numpy as jnp
from jax import lax
from jax.experimental import pallas as pl
from jax.experimental.pallas import tpu as pltpu

DEGREE = 3          # NURBSLayer.degree
EPSILON = 1e-07     # NURBSLayer.EPSILON


def compute_open_knot_vector(n_control_points: int):
    """Same open knot vector as NURBSLayer._compute_open_knot_vector (float32)."""
    knots = (
        [0.0] * (DEGREE + 1)
        + [i / (n_control_points - DEGREE) for i in range(1, n_control_points - DEGREE)]
        + [1.0] * (DEGREE + 1)
    )
    return np.asarray(knots, dtype=np.float32)


def make_nurbs_kernel(bb, n_cp, n_dp, knots_f32):
    """Returns the Pallas kernel body. All sizes and knot-derived constants are baked in."""
    k = [float(v) for v in knots_f32]          # python floats of the exact f32 knot values
    eps32 = np.float32(EPSILON)

    def kernel(x_ref, w1_ref, b1_ref, w2_ref, b2_ref, w3_ref, b3_ref, tri_ref,
               cp_ref, wt_ref, dp_ref, ubint_ref):
        # ---- generate_intervals: 3 x (Linear -> Softmax(dim=1)) -> ConstantPad1d([1,0], 0) ----
        def softmax(z):
            z = z - jnp.max(z, axis=-1, keepdims=True)
            e = jnp.exp(z)
            # reciprocal + multiply instead of a full-vector divide
            return e * (jnp.float32(1.0) / jnp.sum(e, axis=-1, keepdims=True))

        x = x_ref[...]                                                         # (bb, F)
        h = softmax(jnp.dot(x, w1_ref[...], preferred_element_type=jnp.float32) + b1_ref[...])
        h = softmax(jnp.dot(h, w2_ref[...], preferred_element_type=jnp.float32) + b2_ref[...])
        sm = softmax(jnp.dot(h, w3_ref[...], preferred_element_type=jnp.float32) + b3_ref[...])

        # intvls = pad-left-with-0 of the softmax output; ub = cumsum(intvls).clamp(0, 1)
        intvls = jnp.concatenate([jnp.zeros((bb, 1), jnp.float32), sm], axis=-1)   # (bb, n_dp)
        # cumsum via upper-triangular MXU matmul (operator hoisted to a constant input)
        t = jnp.clip(jnp.dot(intvls, tri_ref[...], preferred_element_type=jnp.float32), 0.0, 1.0)
        # single lane-dense (bb, 2*n_dp) store; t stays in registers (no VMEM round trip)
        ubint_ref[...] = jnp.concatenate([t, intvls], axis=-1)

        # ---- degree-0 basis: hoisted comparisons, identically-zero entries pruned ----
        geq = {}

        def step(v):  # indicator(t >= v) as f32, computed once per distinct knot value
            if v not in geq:
                geq[v] = jnp.where(t >= v, jnp.float32(1.0), jnp.float32(0.0))
            return geq[v]

        Ncur = []
        for i in range(n_cp + DEGREE):
            if k[i] == k[i + 1]:
                Ncur.append(None)                              # identically zero (repeated knot)
            else:
                # (k[i] <= t) & (t < k[i+1]) as a difference of monotone step functions
                Ncur.append(step(k[i]) - step(k[i + 1]))

        # ---- Cox-de Boor recursion: constant reciprocals, hoisted affine terms ----
        t_minus = {}
        minus_t = {}

        def t_minus_of(v):
            if v not in t_minus:
                t_minus[v] = t if v == 0.0 else t - v
            return t_minus[v]

        def minus_t_of(v):
            if v not in minus_t:
                minus_t[v] = v - t
            return minus_t[v]

        for p in range(1, DEGREE + 1):
            Nnext = []
            for i in range(n_cp + DEGREE - p):
                terms = []
                if Ncur[i] is not None:
                    inv_a = float(np.float32(1.0)
                                  / (np.float32(k[i + p]) - np.float32(k[i]) + eps32))
                    terms.append(t_minus_of(k[i]) * inv_a * Ncur[i])
                if Ncur[i + 1] is not None:
                    inv_b = float(np.float32(1.0)
                                  / (np.float32(k[i + p + 1]) - np.float32(k[i + 1]) + eps32))
                    terms.append(minus_t_of(k[i + p + 1]) * inv_b * Ncur[i + 1])
                if not terms:
                    Nnext.append(None)
                elif len(terms) == 1:
                    Nnext.append(terms[0])
                else:
                    Nnext.append(terms[0] + terms[1])
            Ncur = Nnext

        # Ncur now holds the n_cp degree-DEGREE basis functions, each (bb, n_dp).
        basis = [b if b is not None else jnp.zeros((bb, n_dp), jnp.float32) for b in Ncur]

        # ---- rational (NURBS) combination: one tiny MXU matmul per batch row ----
        wt = wt_ref[...]                                                       # (bb, n_cp)
        for b in range(bb):                                                    # static, small
            n_b = jnp.concatenate([basis[i][b:b + 1, :] for i in range(n_cp)], axis=0)  # (n_cp, n_dp)
            w_b = wt[b:b + 1, :]                                               # (1, n_cp)
            m_b = jnp.concatenate([w_b, cp_ref[b] * w_b], axis=0)              # (1+D, n_cp)
            out_b = jnp.dot(m_b, n_b, preferred_element_type=jnp.float32)      # (1+D, n_dp)
            # one exact reciprocal, D multiplies (instead of D divides)
            inv_den = jnp.float32(1.0) / (out_b[0:1, :] + jnp.float32(EPSILON))
            dp_ref[b] = out_b[1:, :] * inv_den                                 # (D, n_dp)

    return kernel


def nurbs_forward(x, control_points, weights, linear_params, n_control_points, n_data_points):
    """Pallas-backed equivalent of NURBSLayer.forward.

    x:              (B, in_features)           float32
    control_points: (B, D, n_control_points)   float32
    weights:        (B, 1, n_control_points)   float32
    linear_params:  (W1 (F, n_dp-1), b1 (n_dp-1,), W2 (n_dp-1, n_dp-1), b2, W3, b3)
                    -- the three nn.Linear layers of generate_intervals (weights transposed).
    returns (dp (B, D, n_dp), ub (B, 1, n_dp), intvls (B, n_dp)) -- same as the torch module.
    """
    W1, b1, W2, b2, W3, b3 = linear_params
    x = jnp.asarray(x, jnp.float32)
    B, F = x.shape
    D = control_points.shape[1]
    n_cp, n_dp = n_control_points, n_data_points
    nd1 = n_dp - 1

    # batch rows per grid step: fill 8 sublanes when possible, grid axis is "parallel"
    bb = 8 if (B % 8 == 0) else B
    grid = (B // bb,)

    knots = compute_open_knot_vector(n_cp)
    kernel = make_nurbs_kernel(bb, n_cp, n_dp, knots)

    tri = jnp.triu(jnp.ones((n_dp, n_dp), jnp.float32))      # hoisted cumsum operator (constant)
    cp = control_points.astype(jnp.float32)                  # (B, D, n_cp)
    wt = weights[:, 0, :].astype(jnp.float32)                # (B, n_cp)

    dp, ubint = pl.pallas_call(
        kernel,
        grid=grid,
        in_specs=[
            pl.BlockSpec((bb, F), lambda i: (i, 0)),          # x
            pl.BlockSpec((F, nd1), lambda i: (0, 0)),         # W1
            pl.BlockSpec((1, nd1), lambda i: (0, 0)),         # b1
            pl.BlockSpec((nd1, nd1), lambda i: (0, 0)),       # W2
            pl.BlockSpec((1, nd1), lambda i: (0, 0)),         # b2
            pl.BlockSpec((nd1, nd1), lambda i: (0, 0)),       # W3
            pl.BlockSpec((1, nd1), lambda i: (0, 0)),         # b3
            pl.BlockSpec((n_dp, n_dp), lambda i: (0, 0)),     # tri (cumsum operator)
            pl.BlockSpec((bb, D, n_cp), lambda i: (i, 0, 0)), # control points
            pl.BlockSpec((bb, n_cp), lambda i: (i, 0)),       # weights
        ],
        out_specs=[
            pl.BlockSpec((bb, D, n_dp), lambda i: (i, 0, 0)),     # dp
            pl.BlockSpec((bb, 2 * n_dp), lambda i: (i, 0)),       # [ub | intvls] packed (128 lanes)
        ],
        out_shape=(
            jax.ShapeDtypeStruct((B, D, n_dp), jnp.float32),
            jax.ShapeDtypeStruct((B, 2 * n_dp), jnp.float32),
        ),
        compiler_params=pltpu.CompilerParams(dimension_semantics=("parallel",)),
    )(
        x,
        W1.astype(jnp.float32), b1.reshape(1, nd1).astype(jnp.float32),
        W2.astype(jnp.float32), b2.reshape(1, nd1).astype(jnp.float32),
        W3.astype(jnp.float32), b3.reshape(1, nd1).astype(jnp.float32),
        tri, cp, wt,
    )

    ub = ubint[:, :n_dp][:, None, :]     # (B, 1, n_dp)  == torch .unsqueeze(1)
    intvls = ubint[:, n_dp:]             # (B, n_dp)
    return dp, ub, intvls


def reference_forward(x, control_points, weights, linear_params, n_cp, n_dp):
    """Pure-JAX mirror of the PyTorch module (for self-check)."""
    W1, b1, W2, b2, W3, b3 = linear_params
    knots = compute_open_knot_vector(n_cp)
    B = x.shape[0]
    hp = lax.Precision.HIGHEST
    h = jax.nn.softmax(jnp.dot(x, W1, precision=hp) + b1, axis=1)
    h = jax.nn.softmax(jnp.dot(h, W2, precision=hp) + b2, axis=1)
    sm = jax.nn.softmax(jnp.dot(h, W3, precision=hp) + b3, axis=1)
    intvls = jnp.concatenate([jnp.zeros((B, 1), jnp.float32), sm], axis=1)
    ub = jnp.clip(jnp.cumsum(intvls, -1), 0.0, 1.0)[:, None, :]
    t = ub
    eps = np.float32(EPSILON)
    Ncur = [jnp.where((float(knots[i]) <= t) & (t < float(knots[i + 1])), 1.0, 0.0)
            for i in range(n_cp + DEGREE)]
    for p in range(1, DEGREE + 1):
        Ncur = [
            (t - float(knots[i])) / float(knots[i + p] - knots[i] + eps) * Ncur[i]
            + (float(knots[i + p + 1]) - t)
            / float(knots[i + p + 1] - knots[i + 1] + eps) * Ncur[i + 1]
            for i in range(n_cp + DEGREE - p)
        ]
    N = jnp.stack(Ncur, axis=-2)                              # (B, 1, n_cp, n_dp)
    cp_w = control_points * weights
    dp = jnp.sum(N * cp_w[..., None], axis=2)
    N_w = jnp.sum(N * weights[..., None], axis=2)
    dp = dp / (N_w + EPSILON)
    return dp, ub, intvls


if __name__ == "__main__":
    in_features = 32
    n_control_points = 16
    n_data_points = 64
    B, D = 2, 2
    nd1 = n_data_points - 1

    key = jax.random.PRNGKey(0)
    keys = jax.random.split(key, 9)

    x = jax.random.normal(keys[0], (B, in_features), dtype=jnp.float32)
    control_points = jax.random.normal(keys[1], (B, D, n_control_points), dtype=jnp.float32)
    weights = jax.nn.sigmoid(jax.random.normal(keys[2], (B, 1, n_control_points), dtype=jnp.float32))

    # nn.Linear default (uniform) init for the three layers of generate_intervals.
    lim1 = 1.0 / math.sqrt(in_features)
    lim2 = 1.0 / math.sqrt(nd1)
    W1 = jax.random.uniform(keys[3], (in_features, nd1), jnp.float32, -lim1, lim1)
    b1 = jax.random.uniform(keys[4], (nd1,), jnp.float32, -lim1, lim1)
    W2 = jax.random.uniform(keys[5], (nd1, nd1), jnp.float32, -lim2, lim2)
    b2 = jax.random.uniform(keys[6], (nd1,), jnp.float32, -lim2, lim2)
    W3 = jax.random.uniform(keys[7], (nd1, nd1), jnp.float32, -lim2, lim2)
    b3 = jax.random.uniform(keys[8], (nd1,), jnp.float32, -lim2, lim2)
    params = (W1, b1, W2, b2, W3, b3)

    dp, ub, intvls = nurbs_forward(x, control_points, weights, params,
                                   n_control_points, n_data_points)
    jax.block_until_ready((dp, ub, intvls))

    assert dp.shape == (B, D, n_data_points)
    assert ub.shape == (B, 1, n_data_points)
    assert intvls.shape == (B, n_data_points)
    assert bool(jnp.all(jnp.isfinite(dp))) and bool(jnp.all(jnp.isfinite(ub)))

    # Self-check against a pure-JAX reference. The last data point is excluded from the dp check:
    # at u == 1 the open-interval degree-0 test makes the value knife-edge sensitive to cumsum
    # rounding, exactly as in the PyTorch original.
    dp_r, ub_r, intvls_r = reference_forward(x, control_points, weights, params,
                                             n_control_points, n_data_points)
    np.testing.assert_allclose(np.asarray(intvls), np.asarray(intvls_r), atol=1e-5, rtol=1e-4)
    np.testing.assert_allclose(np.asarray(ub), np.asarray(ub_r), atol=3e-5, rtol=1e-4)
    np.testing.assert_allclose(np.asarray(dp[:, :, :-1]), np.asarray(dp_r[:, :, :-1]),
                               atol=2e-4, rtol=1e-3)

    print("KERNEL_OK")
</pallas_src>

<mosaic_0001>
module attributes {stable_mosaic.version = 11 : i64} {
  func.func @kernel(%arg0: i32, %arg1: memref<2x32xf32, #tpu.memory_space<vmem>>, %arg2: memref<32x63xf32, #tpu.memory_space<vmem>>, %arg3: memref<1x63xf32, #tpu.memory_space<vmem>>, %arg4: memref<63x63xf32, #tpu.memory_space<vmem>>, %arg5: memref<1x63xf32, #tpu.memory_space<vmem>>, %arg6: memref<63x63xf32, #tpu.memory_space<vmem>>, %arg7: memref<1x63xf32, #tpu.memory_space<vmem>>, %arg8: memref<64x64xf32, #tpu.memory_space<vmem>>, %arg9: memref<2x2x16xf32, #tpu.memory_space<vmem>>, %arg10: memref<2x16xf32, #tpu.memory_space<vmem>>, %arg11: memref<2x2x64xf32, #tpu.memory_space<vmem>>, %arg12: memref<2x128xf32, #tpu.memory_space<vmem>>) attributes {dimension_semantics = [#tpu.dimension_semantics<parallel>], iteration_bounds = array<i64: 1>, scalar_prefetch = 0 : i64, scratch_operands = 0 : i64, tpu.core_type = #tpu.core_type<tc>, window_params = [{transform_indices = @transform_0, window_bounds = array<i64: 2, 32>}, {pipeline_mode = #tpu.pipeline_mode<synchronous>, transform_indices = @transform_1, window_bounds = array<i64: 32, 63>}, {pipeline_mode = #tpu.pipeline_mode<synchronous>, transform_indices = @transform_2, window_bounds = array<i64: 1, 63>}, {pipeline_mode = #tpu.pipeline_mode<synchronous>, transform_indices = @transform_3, window_bounds = array<i64: 63, 63>}, {pipeline_mode = #tpu.pipeline_mode<synchronous>, transform_indices = @transform_4, window_bounds = array<i64: 1, 63>}, {pipeline_mode = #tpu.pipeline_mode<synchronous>, transform_indices = @transform_5, window_bounds = array<i64: 63, 63>}, {pipeline_mode = #tpu.pipeline_mode<synchronous>, transform_indices = @transform_6, window_bounds = array<i64: 1, 63>}, {pipeline_mode = #tpu.pipeline_mode<synchronous>, transform_indices = @transform_7, window_bounds = array<i64: 64, 64>}, {transform_indices = @transform_8, window_bounds = array<i64: 2, 2, 16>}, {transform_indices = @transform_9, window_bounds = array<i64: 2, 16>}, {transform_indices = @transform_10, window_bounds = array<i64: 2, 2, 64>}, {transform_indices = @transform_11, window_bounds = array<i64: 2, 128>}]} {
    %c0 = arith.constant 0 : index
    %c0_0 = arith.constant 0 : index
    %0 = vector.load %arg1[%c0, %c0_0] : memref<2x32xf32, #tpu.memory_space<vmem>>, vector<2x32xf32>
    %c0_1 = arith.constant 0 : index
    %c0_2 = arith.constant 0 : index
    %1 = vector.load %arg2[%c0_1, %c0_2] : memref<32x63xf32, #tpu.memory_space<vmem>>, vector<32x63xf32>
    %cst = arith.constant dense<0.000000e+00> : vector<2x63xf32>
    %2 = tpu.matmul %0, %1, %cst {dimension_numbers = #tpu.dot_dimension_numbers<[1], [0], [0], [1], [0, 0, 1, 1], [], []>} : vector<2x32xf32>, vector<32x63xf32>, vector<2x63xf32> -> vector<2x63xf32>
    %c0_3 = arith.constant 0 : index
    %c0_4 = arith.constant 0 : index
    %3 = vector.load %arg3[%c0_3, %c0_4] : memref<1x63xf32, #tpu.memory_space<vmem>>, vector<1x63xf32>
    %4 = vector.broadcast %3 : vector<1x63xf32> to vector<2x63xf32>
    %5 = arith.addf %2, %4 : vector<2x63xf32>
    %cst_5 = arith.constant dense<0xFF800000> : vector<2xf32>
    %6 = vector.multi_reduction <maximumf>, %5, %cst_5 [1] : vector<2x63xf32> to vector<2xf32>
    %7 = vector.shape_cast %6 : vector<2xf32> to vector<2x1xf32>
    %8 = vector.broadcast %7 : vector<2x1xf32> to vector<2x63xf32>
    %9 = arith.subf %5, %8 : vector<2x63xf32>
    %10 = math.exp %9 : vector<2x63xf32>
    %cst_6 = arith.constant dense<0.000000e+00> : vector<2xf32>
    %11 = vector.multi_reduction <add>, %10, %cst_6 [1] : vector<2x63xf32> to vector<2xf32>
    %12 = vector.shape_cast %11 : vector<2xf32> to vector<2x1xf32>
    %cst_7 = arith.constant 1.000000e+00 : f32
    %13 = vector.broadcast %cst_7 : f32 to vector<2x1xf32>
    %14 = arith.divf %13, %12 : vector<2x1xf32>
    %15 = vector.broadcast %14 : vector<2x1xf32> to vector<2x63xf32>
    %16 = arith.mulf %10, %15 : vector<2x63xf32>
    %c0_8 = arith.constant 0 : index
    %c0_9 = arith.constant 0 : index
    %17 = vector.load %arg4[%c0_8, %c0_9] : memref<63x63xf32, #tpu.memory_space<vmem>>, vector<63x63xf32>
    %cst_10 = arith.constant dense<0.000000e+00> : vector<2x63xf32>
    %18 = tpu.matmul %16, %17, %cst_10 {dimension_numbers = #tpu.dot_dimension_numbers<[1], [0], [0], [1], [0, 0, 1, 1], [], []>} : vector<2x63xf32>, vector<63x63xf32>, vector<2x63xf32> -> vector<2x63xf32>
    %c0_11 = arith.constant 0 : index
    %c0_12 = arith.constant 0 : index
    %19 = vector.load %arg5[%c0_11, %c0_12] : memref<1x63xf32, #tpu.memory_space<vmem>>, vector<1x63xf32>
    %20 = vector.broadcast %19 : vector<1x63xf32> to vector<2x63xf32>
    %21 = arith.addf %18, %20 : vector<2x63xf32>
    %cst_13 = arith.constant dense<0xFF800000> : vector<2xf32>
    %22 = vector.multi_reduction <maximumf>, %21, %cst_13 [1] : vector<2x63xf32> to vector<2xf32>
    %23 = vector.shape_cast %22 : vector<2xf32> to vector<2x1xf32>
    %24 = vector.broadcast %23 : vector<2x1xf32> to vector<2x63xf32>
    %25 = arith.subf %21, %24 : vector<2x63xf32>
    %26 = math.exp %25 : vector<2x63xf32>
    %cst_14 = arith.constant dense<0.000000e+00> : vector<2xf32>
    %27 = vector.multi_reduction <add>, %26, %cst_14 [1] : vector<2x63xf32> to vector<2xf32>
    %28 = vector.shape_cast %27 : vector<2xf32> to vector<2x1xf32>
    %cst_15 = arith.constant 1.000000e+00 : f32
    %29 = vector.broadcast %cst_15 : f32 to vector<2x1xf32>
    %30 = arith.divf %29, %28 : vector<2x1xf32>
    %31 = vector.broadcast %30 : vector<2x1xf32> to vector<2x63xf32>
    %32 = arith.mulf %26, %31 : vector<2x63xf32>
    %c0_16 = arith.constant 0 : index
    %c0_17 = arith.constant 0 : index
    %33 = vector.load %arg6[%c0_16, %c0_17] : memref<63x63xf32, #tpu.memory_space<vmem>>, vector<63x63xf32>
    %cst_18 = arith.constant dense<0.000000e+00> : vector<2x63xf32>
    %34 = tpu.matmul %32, %33, %cst_18 {dimension_numbers = #tpu.dot_dimension_numbers<[1], [0], [0], [1], [0, 0, 1, 1], [], []>} : vector<2x63xf32>, vector<63x63xf32>, vector<2x63xf32> -> vector<2x63xf32>
    %c0_19 = arith.constant 0 : index
    %c0_20 = arith.constant 0 : index
    %35 = vector.load %arg7[%c0_19, %c0_20] : memref<1x63xf32, #tpu.memory_space<vmem>>, vector<1x63xf32>
    %36 = vector.broadcast %35 : vector<1x63xf32> to vector<2x63xf32>
    %37 = arith.addf %34, %36 : vector<2x63xf32>
    %cst_21 = arith.constant dense<0xFF800000> : vector<2xf32>
    %38 = vector.multi_reduction <maximumf>, %37, %cst_21 [1] : vector<2x63xf32> to vector<2xf32>
    %39 = vector.shape_cast %38 : vector<2xf32> to vector<2x1xf32>
    %40 = vector.broadcast %39 : vector<2x1xf32> to vector<2x63xf32>
    %41 = arith.subf %37, %40 : vector<2x63xf32>
    %42 = math.exp %41 : vector<2x63xf32>
    %cst_22 = arith.constant dense<0.000000e+00> : vector<2xf32>
    %43 = vector.multi_reduction <add>, %42, %cst_22 [1] : vector<2x63xf32> to vector<2xf32>
    %44 = vector.shape_cast %43 : vector<2xf32> to vector<2x1xf32>
    %cst_23 = arith.constant 1.000000e+00 : f32
    %45 = vector.broadcast %cst_23 : f32 to vector<2x1xf32>
    %46 = arith.divf %45, %44 : vector<2x1xf32>
    %47 = vector.broadcast %46 : vector<2x1xf32> to vector<2x63xf32>
    %48 = arith.mulf %42, %47 : vector<2x63xf32>
    %cst_24 = arith.constant 0.000000e+00 : f32
    %49 = vector.broadcast %cst_24 : f32 to vector<2x1xf32>
    %50 = tpu.concatenate %49, %48 in 1 : vector<2x1xf32>, vector<2x63xf32> -> vector<2x64xf32>
    %c0_25 = arith.constant 0 : index
    %c0_26 = arith.constant 0 : index
    %51 = vector.load %arg8[%c0_25, %c0_26] : memref<64x64xf32, #tpu.memory_space<vmem>>, vector<64x64xf32>
    %cst_27 = arith.constant dense<0.000000e+00> : vector<2x64xf32>
    %52 = tpu.matmul %50, %51, %cst_27 {dimension_numbers = #tpu.dot_dimension_numbers<[1], [0], [0], [1], [0, 0, 1, 1], [], []>} : vector<2x64xf32>, vector<64x64xf32>, vector<2x64xf32> -> vector<2x64xf32>
    %cst_28 = arith.constant 0.000000e+00 : f32
    %cst_29 = arith.constant 1.000000e+00 : f32
    %53 = vector.broadcast %cst_28 : f32 to vector<2x64xf32>
    %54 = arith.maximumf %53, %52 : vector<2x64xf32>
    %55 = vector.broadcast %cst_29 : f32 to vector<2x64xf32>
    %56 = arith.minimumf %55, %54 : vector<2x64xf32>
    %57 = tpu.concatenate %56, %50 in 1 : vector<2x64xf32>, vector<2x64xf32> -> vector<2x128xf32>
    %c0_30 = arith.constant 0 : index
    %c0_31 = arith.constant 0 : index
    %58 = vector.load %arg12[%c0_30, %c0_31] : memref<2x128xf32, #tpu.memory_space<vmem>>, vector<2x128xf32>
    tpu.vector_store %arg12[%c0_30, %c0_31], %57 {strides = array<i32>} : memref<2x128xf32, #tpu.memory_space<vmem>>, vector<2x128xf32>,
    %cst_32 = arith.constant 0.000000e+00 : f32
    %59 = vector.broadcast %cst_32 : f32 to vector<2x64xf32>
    %60 = arith.cmpf oge, %56, %59 : vector<2x64xf32>
    %cst_33 = arith.constant 1.000000e+00 : f32
    %cst_34 = arith.constant 0.000000e+00 : f32
    %61 = vector.broadcast %cst_33 : f32 to vector<2x64xf32>
    %62 = vector.broadcast %cst_34 : f32 to vector<2x64xf32>
    %63 = arith.select %60, %61, %62 : vector<2x64xi1>, vector<2x64xf32>
    %cst_35 = arith.constant 0.0769230798 : f32
    %64 = vector.broadcast %cst_35 : f32 to vector<2x64xf32>
    %65 = arith.cmpf oge, %56, %64 : vector<2x64xf32>
    %cst_36 = arith.constant 1.000000e+00 : f32
    %cst_37 = arith.constant 0.000000e+00 : f32
    %66 = vector.broadcast %cst_36 : f32 to vector<2x64xf32>
    %67 = vector.broadcast %cst_37 : f32 to vector<2x64xf32>
    %68 = arith.select %65, %66, %67 : vector<2x64xi1>, vector<2x64xf32>
    %69 = arith.subf %63, %68 : vector<2x64xf32>
    %cst_38 = arith.constant 0.15384616 : f32
    %70 = vector.broadcast %cst_38 : f32 to vector<2x64xf32>
    %71 = arith.cmpf oge, %56, %70 : vector<2x64xf32>
    %cst_39 = arith.constant 1.000000e+00 : f32
    %cst_40 = arith.constant 0.000000e+00 : f32
    %72 = vector.broadcast %cst_39 : f32 to vector<2x64xf32>
    %73 = vector.broadcast %cst_40 : f32 to vector<2x64xf32>
    %74 = arith.select %71, %72, %73 : vector<2x64xi1>, vector<2x64xf32>
    %75 = arith.subf %68, %74 : vector<2x64xf32>
    %cst_41 = arith.constant 0.230769232 : f32
    %76 = vector.broadcast %cst_41 : f32 to vector<2x64xf32>
    %77 = arith.cmpf oge, %56, %76 : vector<2x64xf32>
    %cst_42 = arith.constant 1.000000e+00 : f32
    %cst_43 = arith.constant 0.000000e+00 : f32
    %78 = vector.broadcast %cst_42 : f32 to vector<2x64xf32>
    %79 = vector.broadcast %cst_43 : f32 to vector<2x64xf32>
    %80 = arith.select %77, %78, %79 : vector<2x64xi1>, vector<2x64xf32>
    %81 = arith.subf %74, %80 : vector<2x64xf32>
    %cst_44 = arith.constant 0.307692319 : f32
    %82 = vector.broadcast %cst_44 : f32 to vector<2x64xf32>
    %83 = arith.cmpf oge, %56, %82 : vector<2x64xf32>
    %cst_45 = arith.constant 1.000000e+00 : f32
    %cst_46 = arith.constant 0.000000e+00 : f32
    %84 = vector.broadcast %cst_45 : f32 to vector<2x64xf32>
    %85 = vector.broadcast %cst_46 : f32 to vector<2x64xf32>
    %86 = arith.select %83, %84, %85 : vector<2x64xi1>, vector<2x64xf32>
    %87 = arith.subf %80, %86 : vector<2x64xf32>
    %cst_47 = arith.constant 0.384615391 : f32
    %88 = vector.broadcast %cst_47 : f32 to vector<2x64xf32>
    %89 = arith.cmpf oge, %56, %88 : vector<2x64xf32>
    %cst_48 = arith.constant 1.000000e+00 : f32
    %cst_49 = arith.constant 0.000000e+00 : f32
    %90 = vector.broadcast %cst_48 : f32 to vector<2x64xf32>
    %91 = vector.broadcast %cst_49 : f32 to vector<2x64xf32>
    %92 = arith.select %89, %90, %91 : vector<2x64xi1>, vector<2x64xf32>
    %93 = arith.subf %86, %92 : vector<2x64xf32>
    %cst_50 = arith.constant 0.461538464 : f32
    %94 = vector.broadcast %cst_50 : f32 to vector<2x64xf32>
    %95 = arith.cmpf oge, %56, %94 : vector<2x64xf32>
    %cst_51 = arith.constant 1.000000e+00 : f32
    %cst_52 = arith.constant 0.000000e+00 : f32
    %96 = vector.broadcast %cst_51 : f32 to vector<2x64xf32>
    %97 = vector.broadcast %cst_52 : f32 to vector<2x64xf32>
    %98 = arith.select %95, %96, %97 : vector<2x64xi1>, vector<2x64xf32>
    %99 = arith.subf %92, %98 : vector<2x64xf32>
    %cst_53 = arith.constant 0.538461566 : f32
    %100 = vector.broadcast %cst_53 : f32 to vector<2x64xf32>
    %101 = arith.cmpf oge, %56, %100 : vector<2x64xf32>
    %cst_54 = arith.constant 1.000000e+00 : f32
    %cst_55 = arith.constant 0.000000e+00 : f32
    %102 = vector.broadcast %cst_54 : f32 to vector<2x64xf32>
    %103 = vector.broadcast %cst_55 : f32 to vector<2x64xf32>
    %104 = arith.select %101, %102, %103 : vector<2x64xi1>, vector<2x64xf32>
    %105 = arith.subf %98, %104 : vector<2x64xf32>
    %cst_56 = arith.constant 0.615384638 : f32
    %106 = vector.broadcast %cst_56 : f32 to vector<2x64xf32>
    %107 = arith.cmpf oge, %56, %106 : vector<2x64xf32>
    %cst_57 = arith.constant 1.000000e+00 : f32
    %cst_58 = arith.constant 0.000000e+00 : f32
    %108 = vector.broadcast %cst_57 : f32 to vector<2x64xf32>
    %109 = vector.broadcast %cst_58 : f32 to vector<2x64xf32>
    %110 = arith.select %107, %108, %109 : vector<2x64xi1>, vector<2x64xf32>
    %111 = arith.subf %104, %110 : vector<2x64xf32>
    %cst_59 = arith.constant 0.692307711 : f32
    %112 = vector.broadcast %cst_59 : f32 to vector<2x64xf32>
    %113 = arith.cmpf oge, %56, %112 : vector<2x64xf32>
    %cst_60 = arith.constant 1.000000e+00 : f32
    %cst_61 = arith.constant 0.000000e+00 : f32
    %114 = vector.broadcast %cst_60 : f32 to vector<2x64xf32>
    %115 = vector.broadcast %cst_61 : f32 to vector<2x64xf32>
    %116 = arith.select %113, %114, %115 : vector<2x64xi1>, vector<2x64xf32>
    %117 = arith.subf %110, %116 : vector<2x64xf32>
    %cst_62 = arith.constant 0.769230782 : f32
    %118 = vector.broadcast %cst_62 : f32 to vector<2x64xf32>
    %119 = arith.cmpf oge, %56, %118 : vector<2x64xf32>
    %cst_63 = arith.constant 1.000000e+00 : f32
    %cst_64 = arith.constant 0.000000e+00 : f32
    %120 = vector.broadcast %cst_63 : f32 to vector<2x64xf32>
    %121 = vector.broadcast %cst_64 : f32 to vector<2x64xf32>
    %122 = arith.select %119, %120, %121 : vector<2x64xi1>, vector<2x64xf32>
    %123 = arith.subf %116, %122 : vector<2x64xf32>
    %cst_65 = arith.constant 0.846153855 : f32
    %124 = vector.broadcast %cst_65 : f32 to vector<2x64xf32>
    %125 = arith.cmpf oge, %56, %124 : vector<2x64xf32>
    %cst_66 = arith.constant 1.000000e+00 : f32
    %cst_67 = arith.constant 0.000000e+00 : f32
    %126 = vector.broadcast %cst_66 : f32 to vector<2x64xf32>
    %127 = vector.broadcast %cst_67 : f32 to vector<2x64xf32>
    %128 = arith.select %125, %126, %127 : vector<2x64xi1>, vector<2x64xf32>
    %129 = arith.subf %122, %128 : vector<2x64xf32>
    %cst_68 = arith.constant 0.923076927 : f32
    %130 = vector.broadcast %cst_68 : f32 to vector<2x64xf32>
    %131 = arith.cmpf oge, %56, %130 : vector<2x64xf32>
    %cst_69 = arith.constant 1.000000e+00 : f32
    %cst_70 = arith.constant 0.000000e+00 : f32
    %132 = vector.broadcast %cst_69 : f32 to vector<2x64xf32>
    %133 = vector.broadcast %cst_70 : f32 to vector<2x64xf32>
    %134 = arith.select %131, %132, %133 : vector<2x64xi1>, vector<2x64xf32>
    %135 = arith.subf %128, %134 : vector<2x64xf32>
    %cst_71 = arith.constant 1.000000e+00 : f32
    %136 = vector.broadcast %cst_71 : f32 to vector<2x64xf32>
    %137 = arith.cmpf oge, %56, %136 : vector<2x64xf32>
    %cst_72 = arith.constant 1.000000e+00 : f32
    %cst_73 = arith.constant 0.000000e+00 : f32
    %138 = vector.broadcast %cst_72 : f32 to vector<2x64xf32>
    %139 = vector.broadcast %cst_73 : f32 to vector<2x64xf32>
    %140 = arith.select %137, %138, %139 : vector<2x64xi1>, vector<2x64xf32>
    %141 = arith.subf %134, %140 : vector<2x64xf32>
    %cst_74 = arith.constant 0.0769230798 : f32
    %142 = vector.broadcast %cst_74 : f32 to vector<2x64xf32>
    %143 = arith.subf %142, %56 : vector<2x64xf32>
    %cst_75 = arith.constant 12.9999828 : f32
    %144 = vector.broadcast %cst_75 : f32 to vector<2x64xf32>
    %145 = arith.mulf %143, %144 : vector<2x64xf32>
    %146 = arith.mulf %145, %69 : vector<2x64xf32>
    %cst_76 = arith.constant 12.9999828 : f32
    %147 = vector.broadcast %cst_76 : f32 to vector<2x64xf32>
    %148 = arith.mulf %56, %147 : vector<2x64xf32>
    %149 = arith.mulf %148, %69 : vector<2x64xf32>
    %cst_77 = arith.constant 0.15384616 : f32
    %150 = vector.broadcast %cst_77 : f32 to vector<2x64xf32>
    %151 = arith.subf %150, %56 : vector<2x64xf32>
    %cst_78 = arith.constant 12.9999828 : f32
    %152 = vector.broadcast %cst_78 : f32 to vector<2x64xf32>
    %153 = arith.mulf %151, %152 : vector<2x64xf32>
    %154 = arith.mulf %153, %75 : vector<2x64xf32>
    %155 = arith.addf %149, %154 : vector<2x64xf32>
    %cst_79 = arith.constant 0.0769230798 : f32
    %156 = vector.broadcast %cst_79 : f32 to vector<2x64xf32>
    %157 = arith.subf %56, %156 : vector<2x64xf32>
    %cst_80 = arith.constant 12.9999828 : f32
    %158 = vector.broadcast %cst_80 : f32 to vector<2x64xf32>
    %159 = arith.mulf %157, %158 : vector<2x64xf32>
    %160 = arith.mulf %159, %75 : vector<2x64xf32>
    %cst_81 = arith.constant 0.230769232 : f32
    %161 = vector.broadcast %cst_81 : f32 to vector<2x64xf32>
    %162 = arith.subf %161, %56 : vector<2x64xf32>
    %cst_82 = arith.constant 12.9999847 : f32
    %163 = vector.broadcast %cst_82 : f32 to vector<2x64xf32>
    %164 = arith.mulf %162, %163 : vector<2x64xf32>
    %165 = arith.mulf %164, %81 : vector<2x64xf32>
    %166 = arith.addf %160, %165 : vector<2x64xf32>
    %cst_83 = arith.constant 0.15384616 : f32
    %167 = vector.broadcast %cst_83 : f32 to vector<2x64xf32>
    %168 = arith.subf %56, %167 : vector<2x64xf32>
    %cst_84 = arith.constant 12.9999847 : f32
    %169 = vector.broadcast %cst_84 : f32 to vector<2x64xf32>
    %170 = arith.mulf %168, %169 : vector<2x64xf32>
    %171 = arith.mulf %170, %81 : vector<2x64xf32>
    %cst_85 = arith.constant 0.307692319 : f32
    %172 = vector.broadcast %cst_85 : f32 to vector<2x64xf32>
    %173 = arith.subf %172, %56 : vector<2x64xf32>
    %cst_86 = arith.constant 12.9999819 : f32
    %174 = vector.broadcast %cst_86 : f32 to vector<2x64xf32>
    %175 = arith.mulf %173, %174 : vector<2x64xf32>
    %176 = arith.mulf %175, %87 : vector<2x64xf32>
    %177 = arith.addf %171, %176 : vector<2x64xf32>
    %cst_87 = arith.constant 0.230769232 : f32
    %178 = vector.broadcast %cst_87 : f32 to vector<2x64xf32>
    %179 = arith.subf %56, %178 : vector<2x64xf32>
    %cst_88 = arith.constant 12.9999819 : f32
    %180 = vector.broadcast %cst_88 : f32 to vector<2x64xf32>
    %181 = arith.mulf %179, %180 : vector<2x64xf32>
    %182 = arith.mulf %181, %87 : vector<2x64xf32>
    %cst_89 = arith.constant 0.384615391 : f32
    %183 = vector.broadcast %cst_89 : f32 to vector<2x64xf32>
    %184 = arith.subf %183, %56 : vector<2x64xf32>
    %cst_90 = arith.constant 12.9999847 : f32
    %185 = vector.broadcast %cst_90 : f32 to vector<2x64xf32>
    %186 = arith.mulf %184, %185 : vector<2x64xf32>
    %187 = arith.mulf %186, %93 : vector<2x64xf32>
    %188 = arith.addf %182, %187 : vector<2x64xf32>
    %cst_91 = arith.constant 0.307692319 : f32
    %189 = vector.broadcast %cst_91 : f32 to vector<2x64xf32>
    %190 = arith.subf %56, %189 : vector<2x64xf32>
    %cst_92 = arith.constant 12.9999847 : f32
    %191 = vector.broadcast %cst_92 : f32 to vector<2x64xf32>
    %192 = arith.mulf %190, %191 : vector<2x64xf32>
    %193 = arith.mulf %192, %93 : vector<2x64xf32>
    %cst_93 = arith.constant 0.461538464 : f32
    %194 = vector.broadcast %cst_93 : f32 to vector<2x64xf32>
    %195 = arith.subf %194, %56 : vector<2x64xf32>
    %cst_94 = arith.constant 12.9999847 : f32
    %196 = vector.broadcast %cst_94 : f32 to vector<2x64xf32>
    %197 = arith.mulf %195, %196 : vector<2x64xf32>
    %198 = arith.mulf %197, %99 : vector<2x64xf32>
    %199 = arith.addf %193, %198 : vector<2x64xf32>
    %cst_95 = arith.constant 0.384615391 : f32
    %200 = vector.broadcast %cst_95 : f32 to vector<2x64xf32>
    %201 = arith.subf %56, %200 : vector<2x64xf32>
    %cst_96 = arith.constant 12.9999847 : f32
    %202 = vector.broadcast %cst_96 : f32 to vector<2x64xf32>
    %203 = arith.mulf %201, %202 : vector<2x64xf32>
    %204 = arith.mulf %203, %99 : vector<2x64xf32>
    %cst_97 = arith.constant 0.538461566 : f32
    %205 = vector.broadcast %cst_97 : f32 to vector<2x64xf32>
    %206 = arith.subf %205, %56 : vector<2x64xf32>
    %cst_98 = arith.constant 12.999979 : f32
    %207 = vector.broadcast %cst_98 : f32 to vector<2x64xf32>
    %208 = arith.mulf %206, %207 : vector<2x64xf32>
    %209 = arith.mulf %208, %105 : vector<2x64xf32>
    %210 = arith.addf %204, %209 : vector<2x64xf32>
    %cst_99 = arith.constant 0.461538464 : f32
    %211 = vector.broadcast %cst_99 : f32 to vector<2x64xf32>
    %212 = arith.subf %56, %211 : vector<2x64xf32>
    %cst_100 = arith.constant 12.999979 : f32
    %213 = vector.broadcast %cst_100 : f32 to vector<2x64xf32>
    %214 = arith.mulf %212, %213 : vector<2x64xf32>
    %215 = arith.mulf %214, %105 : vector<2x64xf32>
    %cst_101 = arith.constant 0.615384638 : f32
    %216 = vector.broadcast %cst_101 : f32 to vector<2x64xf32>
    %217 = arith.subf %216, %56 : vector<2x64xf32>
    %cst_102 = arith.constant 12.9999847 : f32
    %218 = vector.broadcast %cst_102 : f32 to vector<2x64xf32>
    %219 = arith.mulf %217, %218 : vector<2x64xf32>
    %220 = arith.mulf %219, %111 : vector<2x64xf32>
    %221 = arith.addf %215, %220 : vector<2x64xf32>
    %cst_103 = arith.constant 0.538461566 : f32
    %222 = vector.broadcast %cst_103 : f32 to vector<2x64xf32>
    %223 = arith.subf %56, %222 : vector<2x64xf32>
    %cst_104 = arith.constant 12.9999847 : f32
    %224 = vector.broadcast %cst_104 : f32 to vector<2x64xf32>
    %225 = arith.mulf %223, %224 : vector<2x64xf32>
    %226 = arith.mulf %225, %111 : vector<2x64xf32>
    %cst_105 = arith.constant 0.692307711 : f32
    %227 = vector.broadcast %cst_105 : f32 to vector<2x64xf32>
    %228 = arith.subf %227, %56 : vector<2x64xf32>
    %cst_106 = arith.constant 12.9999847 : f32
    %229 = vector.broadcast %cst_106 : f32 to vector<2x64xf32>
    %230 = arith.mulf %228, %229 : vector<2x64xf32>
    %231 = arith.mulf %230, %117 : vector<2x64xf32>
    %232 = arith.addf %226, %231 : vector<2x64xf32>
    %cst_107 = arith.constant 0.615384638 : f32
    %233 = vector.broadcast %cst_107 : f32 to vector<2x64xf32>
    %234 = arith.subf %56, %233 : vector<2x64xf32>
    %cst_108 = arith.constant 12.9999847 : f32
    %235 = vector.broadcast %cst_108 : f32 to vector<2x64xf32>
    %236 = arith.mulf %234, %235 : vector<2x64xf32>
    %237 = arith.mulf %236, %117 : vector<2x64xf32>
    %cst_109 = arith.constant 0.769230782 : f32
    %238 = vector.broadcast %cst_109 : f32 to vector<2x64xf32>
    %239 = arith.subf %238, %56 : vector<2x64xf32>
    %cst_110 = arith.constant 12.9999847 : f32
    %240 = vector.broadcast %cst_110 : f32 to vector<2x64xf32>
    %241 = arith.mulf %239, %240 : vector<2x64xf32>
    %242 = arith.mulf %241, %123 : vector<2x64xf32>
    %243 = arith.addf %237, %242 : vector<2x64xf32>
    %cst_111 = arith.constant 0.692307711 : f32
    %244 = vector.broadcast %cst_111 : f32 to vector<2x64xf32>
    %245 = arith.subf %56, %244 : vector<2x64xf32>
    %cst_112 = arith.constant 12.9999847 : f32
    %246 = vector.broadcast %cst_112 : f32 to vector<2x64xf32>
    %247 = arith.mulf %245, %246 : vector<2x64xf32>
    %248 = arith.mulf %247, %123 : vector<2x64xf32>
    %cst_113 = arith.constant 0.846153855 : f32
    %249 = vector.broadcast %cst_113 : f32 to vector<2x64xf32>
    %250 = arith.subf %249, %56 : vector<2x64xf32>
    %cst_114 = arith.constant 12.9999847 : f32
    %251 = vector.broadcast %cst_114 : f32 to vector<2x64xf32>
    %252 = arith.mulf %250, %251 : vector<2x64xf32>
    %253 = arith.mulf %252, %129 : vector<2x64xf32>
    %254 = arith.addf %248, %253 : vector<2x64xf32>
    %cst_115 = arith.constant 0.769230782 : f32
    %255 = vector.broadcast %cst_115 : f32 to vector<2x64xf32>
    %256 = arith.subf %56, %255 : vector<2x64xf32>
    %cst_116 = arith.constant 12.9999847 : f32
    %257 = vector.broadcast %cst_116 : f32 to vector<2x64xf32>
    %258 = arith.mulf %256, %257 : vector<2x64xf32>
    %259 = arith.mulf %258, %129 : vector<2x64xf32>
    %cst_117 = arith.constant 0.923076927 : f32
    %260 = vector.broadcast %cst_117 : f32 to vector<2x64xf32>
    %261 = arith.subf %260, %56 : vector<2x64xf32>
    %cst_118 = arith.constant 12.9999847 : f32
    %262 = vector.broadcast %cst_118 : f32 to vector<2x64xf32>
    %263 = arith.mulf %261, %262 : vector<2x64xf32>
    %264 = arith.mulf %263, %135 : vector<2x64xf32>
    %265 = arith.addf %259, %264 : vector<2x64xf32>
    %cst_119 = arith.constant 0.846153855 : f32
    %266 = vector.broadcast %cst_119 : f32 to vector<2x64xf32>
    %267 = arith.subf %56, %266 : vector<2x64xf32>
    %cst_120 = arith.constant 12.9999847 : f32
    %268 = vector.broadcast %cst_120 : f32 to vector<2x64xf32>
    %269 = arith.mulf %267, %268 : vector<2x64xf32>
    %270 = arith.mulf %269, %135 : vector<2x64xf32>
    %cst_121 = arith.constant 1.000000e+00 : f32
    %271 = vector.broadcast %cst_121 : f32 to vector<2x64xf32>
    %272 = arith.subf %271, %56 : vector<2x64xf32>
    %cst_122 = arith.constant 12.9999847 : f32
    %273 = vector.broadcast %cst_122 : f32 to vector<2x64xf32>
    %274 = arith.mulf %272, %273 : vector<2x64xf32>
    %275 = arith.mulf %274, %141 : vector<2x64xf32>
    %276 = arith.addf %270, %275 : vector<2x64xf32>
    %cst_123 = arith.constant 0.923076927 : f32
    %277 = vector.broadcast %cst_123 : f32 to vector<2x64xf32>
    %278 = arith.subf %56, %277 : vector<2x64xf32>
    %cst_124 = arith.constant 12.9999847 : f32
    %279 = vector.broadcast %cst_124 : f32 to vector<2x64xf32>
    %280 = arith.mulf %278, %279 : vector<2x64xf32>
    %281 = arith.mulf %280, %141 : vector<2x64xf32>
    %cst_125 = arith.constant 12.9999828 : f32
    %282 = vector.broadcast %cst_125 : f32 to vector<2x64xf32>
    %283 = arith.mulf %143, %282 : vector<2x64xf32>
    %284 = arith.mulf %283, %146 : vector<2x64xf32>
    %cst_126 = arith.constant 12.9999828 : f32
    %285 = vector.broadcast %cst_126 : f32 to vector<2x64xf32>
    %286 = arith.mulf %56, %285 : vector<2x64xf32>
    %287 = arith.mulf %286, %146 : vector<2x64xf32>
    %cst_127 = arith.constant 6.49999523 : f32
    %288 = vector.broadcast %cst_127 : f32 to vector<2x64xf32>
    %289 = arith.mulf %151, %288 : vector<2x64xf32>
    %290 = arith.mulf %289, %155 : vector<2x64xf32>
    %291 = arith.addf %287, %290 : vector<2x64xf32>
    %cst_128 = arith.constant 6.49999523 : f32
    %292 = vector.broadcast %cst_128 : f32 to vector<2x64xf32>
    %293 = arith.mulf %56, %292 : vector<2x64xf32>
    %294 = arith.mulf %293, %155 : vector<2x64xf32>
    %cst_129 = arith.constant 6.49999619 : f32
    %295 = vector.broadcast %cst_129 : f32 to vector<2x64xf32>
    %296 = arith.mulf %162, %295 : vector<2x64xf32>
    %297 = arith.mulf %296, %166 : vector<2x64xf32>
    %298 = arith.addf %294, %297 : vector<2x64xf32>
    %cst_130 = arith.constant 6.49999619 : f32
    %299 = vector.broadcast %cst_130 : f32 to vector<2x64xf32>
    %300 = arith.mulf %157, %299 : vector<2x64xf32>
    %301 = arith.mulf %300, %166 : vector<2x64xf32>
    %cst_131 = arith.constant 6.49999523 : f32
    %302 = vector.broadcast %cst_131 : f32 to vector<2x64xf32>
    %303 = arith.mulf %173, %302 : vector<2x64xf32>
    %304 = arith.mulf %303, %177 : vector<2x64xf32>
    %305 = arith.addf %301, %304 : vector<2x64xf32>
    %cst_132 = arith.constant 6.49999523 : f32
    %306 = vector.broadcast %cst_132 : f32 to vector<2x64xf32>
    %307 = arith.mulf %168, %306 : vector<2x64xf32>
    %308 = arith.mulf %307, %177 : vector<2x64xf32>
    %cst_133 = arith.constant 6.49999523 : f32
    %309 = vector.broadcast %cst_133 : f32 to vector<2x64xf32>
    %310 = arith.mulf %184, %309 : vector<2x64xf32>
    %311 = arith.mulf %310, %188 : vector<2x64xf32>
    %312 = arith.addf %308, %311 : vector<2x64xf32>
    %cst_134 = arith.constant 6.49999523 : f32
    %313 = vector.broadcast %cst_134 : f32 to vector<2x64xf32>
    %314 = arith.mulf %179, %313 : vector<2x64xf32>
    %315 = arith.mulf %314, %188 : vector<2x64xf32>
    %cst_135 = arith.constant 6.49999619 : f32
    %316 = vector.broadcast %cst_135 : f32 to vector<2x64xf32>
    %317 = arith.mulf %195, %316 : vector<2x64xf32>
    %318 = arith.mulf %317, %199 : vector<2x64xf32>
    %319 = arith.addf %315, %318 : vector<2x64xf32>
    %cst_136 = arith.constant 6.49999619 : f32
    %320 = vector.broadcast %cst_136 : f32 to vector<2x64xf32>
    %321 = arith.mulf %190, %320 : vector<2x64xf32>
    %322 = arith.mulf %321, %199 : vector<2x64xf32>
    %cst_137 = arith.constant 6.49999475 : f32
    %323 = vector.broadcast %cst_137 : f32 to vector<2x64xf32>
    %324 = arith.mulf %206, %323 : vector<2x64xf32>
    %325 = arith.mulf %324, %210 : vector<2x64xf32>
    %326 = arith.addf %322, %325 : vector<2x64xf32>
    %cst_138 = arith.constant 6.49999475 : f32
    %327 = vector.broadcast %cst_138 : f32 to vector<2x64xf32>
    %328 = arith.mulf %201, %327 : vector<2x64xf32>
    %329 = arith.mulf %328, %210 : vector<2x64xf32>
    %cst_139 = arith.constant 6.49999475 : f32
    %330 = vector.broadcast %cst_139 : f32 to vector<2x64xf32>
    %331 = arith.mulf %217, %330 : vector<2x64xf32>
    %332 = arith.mulf %331, %221 : vector<2x64xf32>
    %333 = arith.addf %329, %332 : vector<2x64xf32>
    %cst_140 = arith.constant 6.49999475 : f32
    %334 = vector.broadcast %cst_140 : f32 to vector<2x64xf32>
    %335 = arith.mulf %212, %334 : vector<2x64xf32>
    %336 = arith.mulf %335, %221 : vector<2x64xf32>
    %cst_141 = arith.constant 6.49999619 : f32
    %337 = vector.broadcast %cst_141 : f32 to vector<2x64xf32>
    %338 = arith.mulf %228, %337 : vector<2x64xf32>
    %339 = arith.mulf %338, %232 : vector<2x64xf32>
    %340 = arith.addf %336, %339 : vector<2x64xf32>
    %cst_142 = arith.constant 6.49999619 : f32
    %341 = vector.broadcast %cst_142 : f32 to vector<2x64xf32>
    %342 = arith.mulf %223, %341 : vector<2x64xf32>
    %343 = arith.mulf %342, %232 : vector<2x64xf32>
    %cst_143 = arith.constant 6.49999619 : f32
    %344 = vector.broadcast %cst_143 : f32 to vector<2x64xf32>
    %345 = arith.mulf %239, %344 : vector<2x64xf32>
    %346 = arith.mulf %345, %243 : vector<2x64xf32>
    %347 = arith.addf %343, %346 : vector<2x64xf32>
    %cst_144 = arith.constant 6.49999619 : f32
    %348 = vector.broadcast %cst_144 : f32 to vector<2x64xf32>
    %349 = arith.mulf %234, %348 : vector<2x64xf32>
    %350 = arith.mulf %349, %243 : vector<2x64xf32>
    %cst_145 = arith.constant 6.49999619 : f32
    %351 = vector.broadcast %cst_145 : f32 to vector<2x64xf32>
    %352 = arith.mulf %250, %351 : vector<2x64xf32>
    %353 = arith.mulf %352, %254 : vector<2x64xf32>
    %354 = arith.addf %350, %353 : vector<2x64xf32>
    %cst_146 = arith.constant 6.49999619 : f32
    %355 = vector.broadcast %cst_146 : f32 to vector<2x64xf32>
    %356 = arith.mulf %245, %355 : vector<2x64xf32>
    %357 = arith.mulf %356, %254 : vector<2x64xf32>
    %cst_147 = arith.constant 6.49999619 : f32
    %358 = vector.broadcast %cst_147 : f32 to vector<2x64xf32>
    %359 = arith.mulf %261, %358 : vector<2x64xf32>
    %360 = arith.mulf %359, %265 : vector<2x64xf32>
    %361 = arith.addf %357, %360 : vector<2x64xf32>
    %cst_148 = arith.constant 6.49999619 : f32
    %362 = vector.broadcast %cst_148 : f32 to vector<2x64xf32>
    %363 = arith.mulf %256, %362 : vector<2x64xf32>
    %364 = arith.mulf %363, %265 : vector<2x64xf32>
    %cst_149 = arith.constant 6.49999619 : f32
    %365 = vector.broadcast %cst_149 : f32 to vector<2x64xf32>
    %366 = arith.mulf %272, %365 : vector<2x64xf32>
    %367 = arith.mulf %366, %276 : vector<2x64xf32>
    %368 = arith.addf %364, %367 : vector<2x64xf32>
    %cst_150 = arith.constant 6.49999619 : f32
    %369 = vector.broadcast %cst_150 : f32 to vector<2x64xf32>
    %370 = arith.mulf %267, %369 : vector<2x64xf32>
    %371 = arith.mulf %370, %276 : vector<2x64xf32>
    %cst_151 = arith.constant 12.9999847 : f32
    %372 = vector.broadcast %cst_151 : f32 to vector<2x64xf32>
    %373 = arith.mulf %272, %372 : vector<2x64xf32>
    %374 = arith.mulf %373, %281 : vector<2x64xf32>
    %375 = arith.addf %371, %374 : vector<2x64xf32>
    %cst_152 = arith.constant 12.9999847 : f32
    %376 = vector.broadcast %cst_152 : f32 to vector<2x64xf32>
    %377 = arith.mulf %278, %376 : vector<2x64xf32>
    %378 = arith.mulf %377, %281 : vector<2x64xf32>
    %cst_153 = arith.constant 12.9999828 : f32
    %379 = vector.broadcast %cst_153 : f32 to vector<2x64xf32>
    %380 = arith.mulf %143, %379 : vector<2x64xf32>
    %381 = arith.mulf %380, %284 : vector<2x64xf32>
    %cst_154 = arith.constant 12.9999828 : f32
    %382 = vector.broadcast %cst_154 : f32 to vector<2x64xf32>
    %383 = arith.mulf %56, %382 : vector<2x64xf32>
    %384 = arith.mulf %383, %284 : vector<2x64xf32>
    %cst_155 = arith.constant 6.49999523 : f32
    %385 = vector.broadcast %cst_155 : f32 to vector<2x64xf32>
    %386 = arith.mulf %151, %385 : vector<2x64xf32>
    %387 = arith.mulf %386, %291 : vector<2x64xf32>
    %388 = arith.addf %384, %387 : vector<2x64xf32>
    %cst_156 = arith.constant 6.49999523 : f32
    %389 = vector.broadcast %cst_156 : f32 to vector<2x64xf32>
    %390 = arith.mulf %56, %389 : vector<2x64xf32>
    %391 = arith.mulf %390, %291 : vector<2x64xf32>
    %cst_157 = arith.constant 4.33333158 : f32
    %392 = vector.broadcast %cst_157 : f32 to vector<2x64xf32>
    %393 = arith.mulf %162, %392 : vector<2x64xf32>
    %394 = arith.mulf %393, %298 : vector<2x64xf32>
    %395 = arith.addf %391, %394 : vector<2x64xf32>
    %cst_158 = arith.constant 4.33333158 : f32
    %396 = vector.broadcast %cst_158 : f32 to vector<2x64xf32>
    %397 = arith.mulf %56, %396 : vector<2x64xf32>
    %398 = arith.mulf %397, %298 : vector<2x64xf32>
    %cst_159 = arith.constant 4.33333111 : f32
    %399 = vector.broadcast %cst_159 : f32 to vector<2x64xf32>
    %400 = arith.mulf %173, %399 : vector<2x64xf32>
    %401 = arith.mulf %400, %305 : vector<2x64xf32>
    %402 = arith.addf %398, %401 : vector<2x64xf32>
    %cst_160 = arith.constant 4.33333111 : f32
    %403 = vector.broadcast %cst_160 : f32 to vector<2x64xf32>
    %404 = arith.mulf %157, %403 : vector<2x64xf32>
    %405 = arith.mulf %404, %305 : vector<2x64xf32>
    %cst_161 = arith.constant 4.33333158 : f32
    %406 = vector.broadcast %cst_161 : f32 to vector<2x64xf32>
    %407 = arith.mulf %184, %406 : vector<2x64xf32>
    %408 = arith.mulf %407, %312 : vector<2x64xf32>
    %409 = arith.addf %405, %408 : vector<2x64xf32>
    %cst_162 = arith.constant 4.33333158 : f32
    %410 = vector.broadcast %cst_162 : f32 to vector<2x64xf32>
    %411 = arith.mulf %168, %410 : vector<2x64xf32>
    %412 = arith.mulf %411, %312 : vector<2x64xf32>
    %cst_163 = arith.constant 4.33333158 : f32
    %413 = vector.broadcast %cst_163 : f32 to vector<2x64xf32>
    %414 = arith.mulf %195, %413 : vector<2x64xf32>
    %415 = arith.mulf %414, %319 : vector<2x64xf32>
    %416 = arith.addf %412, %415 : vector<2x64xf32>
    %cst_164 = arith.constant 4.33333158 : f32
    %417 = vector.broadcast %cst_164 : f32 to vector<2x64xf32>
    %418 = arith.mulf %179, %417 : vector<2x64xf32>
    %419 = arith.mulf %418, %319 : vector<2x64xf32>
    %cst_165 = arith.constant 4.33333111 : f32
    %420 = vector.broadcast %cst_165 : f32 to vector<2x64xf32>
    %421 = arith.mulf %206, %420 : vector<2x64xf32>
    %422 = arith.mulf %421, %326 : vector<2x64xf32>
    %423 = arith.addf %419, %422 : vector<2x64xf32>
    %cst_166 = arith.constant 4.33333111 : f32
    %424 = vector.broadcast %cst_166 : f32 to vector<2x64xf32>
    %425 = arith.mulf %190, %424 : vector<2x64xf32>
    %426 = arith.mulf %425, %326 : vector<2x64xf32>
    %cst_167 = arith.constant 4.33333111 : f32
    %427 = vector.broadcast %cst_167 : f32 to vector<2x64xf32>
    %428 = arith.mulf %217, %427 : vector<2x64xf32>
    %429 = arith.mulf %428, %333 : vector<2x64xf32>
    %430 = arith.addf %426, %429 : vector<2x64xf32>
    %cst_168 = arith.constant 4.33333111 : f32
    %431 = vector.broadcast %cst_168 : f32 to vector<2x64xf32>
    %432 = arith.mulf %201, %431 : vector<2x64xf32>
    %433 = arith.mulf %432, %333 : vector<2x64xf32>
    %cst_169 = arith.constant 4.33333111 : f32
    %434 = vector.broadcast %cst_169 : f32 to vector<2x64xf32>
    %435 = arith.mulf %228, %434 : vector<2x64xf32>
    %436 = arith.mulf %435, %340 : vector<2x64xf32>
    %437 = arith.addf %433, %436 : vector<2x64xf32>
    %cst_170 = arith.constant 4.33333111 : f32
    %438 = vector.broadcast %cst_170 : f32 to vector<2x64xf32>
    %439 = arith.mulf %212, %438 : vector<2x64xf32>
    %440 = arith.mulf %439, %340 : vector<2x64xf32>
    %cst_171 = arith.constant 4.33333158 : f32
    %441 = vector.broadcast %cst_171 : f32 to vector<2x64xf32>
    %442 = arith.mulf %239, %441 : vector<2x64xf32>
    %443 = arith.mulf %442, %347 : vector<2x64xf32>
    %444 = arith.addf %440, %443 : vector<2x64xf32>
    %cst_172 = arith.constant 4.33333158 : f32
    %445 = vector.broadcast %cst_172 : f32 to vector<2x64xf32>
    %446 = arith.mulf %223, %445 : vector<2x64xf32>
    %447 = arith.mulf %446, %347 : vector<2x64xf32>
    %cst_173 = arith.constant 4.33333158 : f32
    %448 = vector.broadcast %cst_173 : f32 to vector<2x64xf32>
    %449 = arith.mulf %250, %448 : vector<2x64xf32>
    %450 = arith.mulf %449, %354 : vector<2x64xf32>
    %451 = arith.addf %447, %450 : vector<2x64xf32>
    %cst_174 = arith.constant 4.33333158 : f32
    %452 = vector.broadcast %cst_174 : f32 to vector<2x64xf32>
    %453 = arith.mulf %234, %452 : vector<2x64xf32>
    %454 = arith.mulf %453, %354 : vector<2x64xf32>
    %cst_175 = arith.constant 4.33333158 : f32
    %455 = vector.broadcast %cst_175 : f32 to vector<2x64xf32>
    %456 = arith.mulf %261, %455 : vector<2x64xf32>
    %457 = arith.mulf %456, %361 : vector<2x64xf32>
    %458 = arith.addf %454, %457 : vector<2x64xf32>
    %cst_176 = arith.constant 4.33333158 : f32
    %459 = vector.broadcast %cst_176 : f32 to vector<2x64xf32>
    %460 = arith.mulf %245, %459 : vector<2x64xf32>
    %461 = arith.mulf %460, %361 : vector<2x64xf32>
    %cst_177 = arith.constant 4.33333158 : f32
    %462 = vector.broadcast %cst_177 : f32 to vector<2x64xf32>
    %463 = arith.mulf %272, %462 : vector<2x64xf32>
    %464 = arith.mulf %463, %368 : vector<2x64xf32>
    %465 = arith.addf %461, %464 : vector<2x64xf32>
    %cst_178 = arith.constant 4.33333158 : f32
    %466 = vector.broadcast %cst_178 : f32 to vector<2x64xf32>
    %467 = arith.mulf %256, %466 : vector<2x64xf32>
    %468 = arith.mulf %467, %368 : vector<2x64xf32>
    %cst_179 = arith.constant 6.49999619 : f32
    %469 = vector.broadcast %cst_179 : f32 to vector<2x64xf32>
    %470 = arith.mulf %272, %469 : vector<2x64xf32>
    %471 = arith.mulf %470, %375 : vector<2x64xf32>
    %472 = arith.addf %468, %471 : vector<2x64xf32>
    %cst_180 = arith.constant 6.49999619 : f32
    %473 = vector.broadcast %cst_180 : f32 to vector<2x64xf32>
    %474 = arith.mulf %267, %473 : vector<2x64xf32>
    %475 = arith.mulf %474, %375 : vector<2x64xf32>
    %cst_181 = arith.constant 12.9999847 : f32
    %476 = vector.broadcast %cst_181 : f32 to vector<2x64xf32>
    %477 = arith.mulf %272, %476 : vector<2x64xf32>
    %478 = arith.mulf %477, %378 : vector<2x64xf32>
    %479 = arith.addf %475, %478 : vector<2x64xf32>
    %cst_182 = arith.constant 12.9999847 : f32
    %480 = vector.broadcast %cst_182 : f32 to vector<2x64xf32>
    %481 = arith.mulf %278, %480 : vector<2x64xf32>
    %482 = arith.mulf %481, %378 : vector<2x64xf32>
    %c0_183 = arith.constant 0 : index
    %c0_184 = arith.constant 0 : index
    %483 = vector.load %arg10[%c0_183, %c0_184] : memref<2x16xf32, #tpu.memory_space<vmem>>, vector<2x16xf32>
    %484 = vector.extract_strided_slice %381 {offsets = [0, 0], sizes = [1, 64], strides = [1, 1]} : vector<2x64xf32> to vector<1x64xf32>
    %485 = vector.extract_strided_slice %388 {offsets = [0, 0], sizes = [1, 64], strides = [1, 1]} : vector<2x64xf32> to vector<1x64xf32>
    %486 = vector.extract_strided_slice %395 {offsets = [0, 0], sizes = [1, 64], strides = [1, 1]} : vector<2x64xf32> to vector<1x64xf32>
    %487 = vector.extract_strided_slice %402 {offsets = [0, 0], sizes = [1, 64], strides = [1, 1]} : vector<2x64xf32> to vector<1x64xf32>
    %488 = vector.extract_strided_slice %409 {offsets = [0, 0], sizes = [1, 64], strides = [1, 1]} : vector<2x64xf32> to vector<1x64xf32>
    %489 = vector.extract_strided_slice %416 {offsets = [0, 0], sizes = [1, 64], strides = [1, 1]} : vector<2x64xf32> to vector<1x64xf32>
    %490 = vector.extract_strided_slice %423 {offsets = [0, 0], sizes = [1, 64], strides = [1, 1]} : vector<2x64xf32> to vector<1x64xf32>
    %491 = vector.extract_strided_slice %430 {offsets = [0, 0], sizes = [1, 64], strides = [1, 1]} : vector<2x64xf32> to vector<1x64xf32>
    %492 = vector.extract_strided_slice %437 {offsets = [0, 0], sizes = [1, 64], strides = [1, 1]} : vector<2x64xf32> to vector<1x64xf32>
    %493 = vector.extract_strided_slice %444 {offsets = [0, 0], sizes = [1, 64], strides = [1, 1]} : vector<2x64xf32> to vector<1x64xf32>
    %494 = vector.extract_strided_slice %451 {offsets = [0, 0], sizes = [1, 64], strides = [1, 1]} : vector<2x64xf32> to vector<1x64xf32>
    %495 = vector.extract_strided_slice %458 {offsets = [0, 0], sizes = [1, 64], strides = [1, 1]} : vector<2x64xf32> to vector<1x64xf32>
    %496 = vector.extract_strided_slice %465 {offsets = [0, 0], sizes = [1, 64], strides = [1, 1]} : vector<2x64xf32> to vector<1x64xf32>
    %497 = vector.extract_strided_slice %472 {offsets = [0, 0], sizes = [1, 64], strides = [1, 1]} : vector<2x64xf32> to vector<1x64xf32>
    %498 = vector.extract_strided_slice %479 {offsets = [0, 0], sizes = [1, 64], strides = [1, 1]} : vector<2x64xf32> to vector<1x64xf32>
    %499 = vector.extract_strided_slice %482 {offsets = [0, 0], sizes = [1, 64], strides = [1, 1]} : vector<2x64xf32> to vector<1x64xf32>
    %500 = tpu.concatenate %484, %485, %486, %487, %488, %489, %490, %491, %492, %493, %494, %495, %496, %497, %498, %499 in 0 : vector<1x64xf32>, vector<1x64xf32>, vector<1x64xf32>, vector<1x64xf32>, vector<1x64xf32>, vector<1x64xf32>, vector<1x64xf32>, vector<1x64xf32>, vector<1x64xf32>, vector<1x64xf32>, vector<1x64xf32>, vector<1x64xf32>, vector<1x64xf32>, vector<1x64xf32>, vector<1x64xf32>, vector<1x64xf32> -> vector<16x64xf32>
    %501 = vector.extract_strided_slice %483 {offsets = [0, 0], sizes = [1, 16], strides = [1, 1]} : vector<2x16xf32> to vector<1x16xf32>
    %c0_185 = arith.constant 0 : index
    %c0_186 = arith.constant 0 : index
    %c0_187 = arith.constant 0 : index
    %502 = vector.load %arg9[%c0_185, %c0_186, %c0_187] : memref<2x2x16xf32, #tpu.memory_space<vmem>>, vector<1x2x16xf32>
    %503 = vector.shape_cast %502 : vector<1x2x16xf32> to vector<2x16xf32>
    %504 = vector.broadcast %501 : vector<1x16xf32> to vector<2x16xf32>
    %505 = arith.mulf %503, %504 : vector<2x16xf32>
    %506 = tpu.concatenate %501, %505 in 0 : vector<1x16xf32>, vector<2x16xf32> -> vector<3x16xf32>
    %cst_188 = arith.constant dense<0.000000e+00> : vector<3x64xf32>
    %507 = tpu.matmul %506, %500, %cst_188 {dimension_numbers = #tpu.dot_dimension_numbers<[1], [0], [0], [1], [0, 0, 1, 1], [], []>} : vector<3x16xf32>, vector<16x64xf32>, vector<3x64xf32> -> vector<3x64xf32>
    %508 = vector.extract_strided_slice %507 {offsets = [0, 0], sizes = [1, 64], strides = [1, 1]} : vector<3x64xf32> to vector<1x64xf32>
    %cst_189 = arith.constant 1.000000e-07 : f32
    %509 = vector.broadcast %cst_189 : f32 to vector<1x64xf32>
    %510 = arith.addf %508, %509 : vector<1x64xf32>
    %cst_190 = arith.constant 1.000000e+00 : f32
    %511 = vector.broadcast %cst_190 : f32 to vector<1x64xf32>
    %512 = arith.divf %511, %510 : vector<1x64xf32>
    %513 = vector.extract_strided_slice %507 {offsets = [1, 0], sizes = [2, 64], strides = [1, 1]} : vector<3x64xf32> to vector<2x64xf32>
    %514 = vector.broadcast %512 : vector<1x64xf32> to vector<2x64xf32>
    %515 = arith.mulf %513, %514 : vector<2x64xf32>
    %c0_191 = arith.constant 0 : index
    %c0_192 = arith.constant 0 : index
    %c0_193 = arith.constant 0 : index
    %516 = vector.load %arg11[%c0_191, %c0_192, %c0_193] : memref<2x2x64xf32, #tpu.memory_space<vmem>>, vector<1x2x64xf32>
    %517 = vector.shape_cast %516 : vector<1x2x64xf32> to vector<2x64xf32>
    %518 = vector.shape_cast %515 : vector<2x64xf32> to vector<1x2x64xf32>
    tpu.vector_store %arg11[%c0_191, %c0_192, %c0_193], %518 {strides = array<i32>} : memref<2x2x64xf32, #tpu.memory_space<vmem>>, vector<1x2x64xf32>,
    %519 = vector.extract_strided_slice %381 {offsets = [1, 0], sizes = [1, 64], strides = [1, 1]} : vector<2x64xf32> to vector<1x64xf32>
    %520 = vector.extract_strided_slice %388 {offsets = [1, 0], sizes = [1, 64], strides = [1, 1]} : vector<2x64xf32> to vector<1x64xf32>
    %521 = vector.extract_strided_slice %395 {offsets = [1, 0], sizes = [1, 64], strides = [1, 1]} : vector<2x64xf32> to vector<1x64xf32>
    %522 = vector.extract_strided_slice %402 {offsets = [1, 0], sizes = [1, 64], strides = [1, 1]} : vector<2x64xf32> to vector<1x64xf32>
    %523 = vector.extract_strided_slice %409 {offsets = [1, 0], sizes = [1, 64], strides = [1, 1]} : vector<2x64xf32> to vector<1x64xf32>
    %524 = vector.extract_strided_slice %416 {offsets = [1, 0], sizes = [1, 64], strides = [1, 1]} : vector<2x64xf32> to vector<1x64xf32>
    %525 = vector.extract_strided_slice %423 {offsets = [1, 0], sizes = [1, 64], strides = [1, 1]} : vector<2x64xf32> to vector<1x64xf32>
    %526 = vector.extract_strided_slice %430 {offsets = [1, 0], sizes = [1, 64], strides = [1, 1]} : vector<2x64xf32> to vector<1x64xf32>
    %527 = vector.extract_strided_slice %437 {offsets = [1, 0], sizes = [1, 64], strides = [1, 1]} : vector<2x64xf32> to vector<1x64xf32>
    %528 = vector.extract_strided_slice %444 {offsets = [1, 0], sizes = [1, 64], strides = [1, 1]} : vector<2x64xf32> to vector<1x64xf32>
    %529 = vector.extract_strided_slice %451 {offsets = [1, 0], sizes = [1, 64], strides = [1, 1]} : vector<2x64xf32> to vector<1x64xf32>
    %530 = vector.extract_strided_slice %458 {offsets = [1, 0], sizes = [1, 64], strides = [1, 1]} : vector<2x64xf32> to vector<1x64xf32>
    %531 = vector.extract_strided_slice %465 {offsets = [1, 0], sizes = [1, 64], strides = [1, 1]} : vector<2x64xf32> to vector<1x64xf32>
    %532 = vector.extract_strided_slice %472 {offsets = [1, 0], sizes = [1, 64], strides = [1, 1]} : vector<2x64xf32> to vector<1x64xf32>
    %533 = vector.extract_strided_slice %479 {offsets = [1, 0], sizes = [1, 64], strides = [1, 1]} : vector<2x64xf32> to vector<1x64xf32>
    %534 = vector.extract_strided_slice %482 {offsets = [1, 0], sizes = [1, 64], strides = [1, 1]} : vector<2x64xf32> to vector<1x64xf32>
    %535 = tpu.concatenate %519, %520, %521, %522, %523, %524, %525, %526, %527, %528, %529, %530, %531, %532, %533, %534 in 0 : vector<1x64xf32>, vector<1x64xf32>, vector<1x64xf32>, vector<1x64xf32>, vector<1x64xf32>, vector<1x64xf32>, vector<1x64xf32>, vector<1x64xf32>, vector<1x64xf32>, vector<1x64xf32>, vector<1x64xf32>, vector<1x64xf32>, vector<1x64xf32>, vector<1x64xf32>, vector<1x64xf32>, vector<1x64xf32> -> vector<16x64xf32>
    %536 = vector.extract_strided_slice %483 {offsets = [1, 0], sizes = [1, 16], strides = [1, 1]} : vector<2x16xf32> to vector<1x16xf32>
    %c1 = arith.constant 1 : index
    %c0_194 = arith.constant 0 : index
    %c0_195 = arith.constant 0 : index
    %537 = vector.load %arg9[%c1, %c0_194, %c0_195] : memref<2x2x16xf32, #tpu.memory_space<vmem>>, vector<1x2x16xf32>
    %538 = vector.shape_cast %537 : vector<1x2x16xf32> to vector<2x16xf32>
    %539 = vector.broadcast %536 : vector<1x16xf32> to vector<2x16xf32>
    %540 = arith.mulf %538, %539 : vector<2x16xf32>
    %541 = tpu.concatenate %536, %540 in 0 : vector<1x16xf32>, vector<2x16xf32> -> vector<3x16xf32>
    %cst_196 = arith.constant dense<0.000000e+00> : vector<3x64xf32>
    %542 = tpu.matmul %541, %535, %cst_196 {dimension_numbers = #tpu.dot_dimension_numbers<[1], [0], [0], [1], [0, 0, 1, 1], [], []>} : vector<3x16xf32>, vector<16x64xf32>, vector<3x64xf32> -> vector<3x64xf32>
    %543 = vector.extract_strided_slice %542 {offsets = [0, 0], sizes = [1, 64], strides = [1, 1]} : vector<3x64xf32> to vector<1x64xf32>
    %cst_197 = arith.constant 1.000000e-07 : f32
    %544 = vector.broadcast %cst_197 : f32 to vector<1x64xf32>
    %545 = arith.addf %543, %544 : vector<1x64xf32>
    %cst_198 = arith.constant 1.000000e+00 : f32
    %546 = vector.broadcast %cst_198 : f32 to vector<1x64xf32>
    %547 = arith.divf %546, %545 : vector<1x64xf32>
    %548 = vector.extract_strided_slice %542 {offsets = [1, 0], sizes = [2, 64], strides = [1, 1]} : vector<3x64xf32> to vector<2x64xf32>
    %549 = vector.broadcast %547 : vector<1x64xf32> to vector<2x64xf32>
    %550 = arith.mulf %548, %549 : vector<2x64xf32>
    %c1_199 = arith.constant 1 : index
    %c0_200 = arith.constant 0 : index
    %c0_201 = arith.constant 0 : index
    %551 = vector.load %arg11[%c1_199, %c0_200, %c0_201] : memref<2x2x64xf32, #tpu.memory_space<vmem>>, vector<1x2x64xf32>
    %552 = vector.shape_cast %551 : vector<1x2x64xf32> to vector<2x64xf32>
    %553 = vector.shape_cast %550 : vector<2x64xf32> to vector<1x2x64xf32>
    tpu.vector_store %arg11[%c1_199, %c0_200, %c0_201], %553 {strides = array<i32>} : memref<2x2x64xf32, #tpu.memory_space<vmem>>, vector<1x2x64xf32>,
    return
  }
  func.func @transform_0(%arg0: i32) -> (i32, i32) {
    %c0_i32 = arith.constant 0 : i32
    %c0_i32_0 = arith.constant 0 : i32
    return %arg0, %c0_i32 : i32, i32
  }
  func.func @transform_1(%arg0: i32) -> (i32, i32) {
    %c0_i32 = arith.constant 0 : i32
    %c0_i32_0 = arith.constant 0 : i32
    %c0_i32_1 = arith.constant 0 : i32
    return %c0_i32, %c0_i32_0 : i32, i32
  }
  func.func @transform_2(%arg0: i32) -> (i32, i32) {
    %c0_i32 = arith.constant 0 : i32
    %c0_i32_0 = arith.constant 0 : i32
    %c0_i32_1 = arith.constant 0 : i32
    return %c0_i32, %c0_i32_0 : i32, i32
  }
  func.func @transform_3(%arg0: i32) -> (i32, i32) {
    %c0_i32 = arith.constant 0 : i32
    %c0_i32_0 = arith.constant 0 : i32
    %c0_i32_1 = arith.constant 0 : i32
    return %c0_i32, %c0_i32_0 : i32, i32
  }
  func.func @transform_4(%arg0: i32) -> (i32, i32) {
    %c0_i32 = arith.constant 0 : i32
    %c0_i32_0 = arith.constant 0 : i32
    %c0_i32_1 = arith.constant 0 : i32
    return %c0_i32, %c0_i32_0 : i32, i32
  }
  func.func @transform_5(%arg0: i32) -> (i32, i32) {
    %c0_i32 = arith.constant 0 : i32
    %c0_i32_0 = arith.constant 0 : i32
    %c0_i32_1 = arith.constant 0 : i32
    return %c0_i32, %c0_i32_0 : i32, i32
  }
  func.func @transform_6(%arg0: i32) -> (i32, i32) {
    %c0_i32 = arith.constant 0 : i32
    %c0_i32_0 = arith.constant 0 : i32
    %c0_i32_1 = arith.constant 0 : i32
    return %c0_i32, %c0_i32_0 : i32, i32
  }
  func.func @transform_7(%arg0: i32) -> (i32, i32) {
    %c0_i32 = arith.constant 0 : i32
    %c0_i32_0 = arith.constant 0 : i32
    %c0_i32_1 = arith.constant 0 : i32
    return %c0_i32, %c0_i32_0 : i32, i32
  }
  func.func @transform_8(%arg0: i32) -> (i32, i32, i32) {
    %c0_i32 = arith.constant 0 : i32
    %c0_i32_0 = arith.constant 0 : i32
    %c0_i32_1 = arith.constant 0 : i32
    return %arg0, %c0_i32, %c0_i32_0 : i32, i32, i32
  }
  func.func @transform_9(%arg0: i32) -> (i32, i32) {
    %c0_i32 = arith.constant 0 : i32
    %c0_i32_0 = arith.constant 0 : i32
    return %arg0, %c0_i32 : i32, i32
  }
  func.func @transform_10(%arg0: i32) -> (i32, i32, i32) {
    %c0_i32 = arith.constant 0 : i32
    %c0_i32_0 = arith.constant 0 : i32
    %c0_i32_1 = arith.constant 0 : i32
    return %arg0, %c0_i32, %c0_i32_0 : i32, i32, i32
  }
  func.func @transform_11(%arg0: i32) -> (i32, i32) {
    %c0_i32 = arith.constant 0 : i32
    %c0_i32_0 = arith.constant 0 : i32
    return %arg0, %c0_i32 : i32, i32
  }
}

</mosaic_0001>

<bundles_post_ra>
// kernel: tpu_custom_call.1
= control target key start
LH: loop header
LB: loop body
LE: loop exit
PB: predicated region body
PF: predicated region fallthrough
CT: control target
= control target key end

     0   :  { %17 = vsyncpa [#allocation3], 0  ;;  %s1905_s0 = inlined_call_operand.hbm [shape: f32[2,32], index: 0, kind: input, shape index: {}]   ;;  %s1906_s1 = inlined_call_operand.hbm [shape: f32[32,63], index: 1, kind: input, shape index: {}]   ;;  %s1907_s2 = inlined_call_operand.vmem [shape: f32[1,63], index: 2, kind: input, shape index: {}]   ;;  %s1908_s3 = inlined_call_operand.hbm [shape: f32[63,63], index: 3, kind: input, shape index: {}]   ;;  %s1909_s4 = inlined_call_operand.hbm [shape: f32[1,63], index: 4, kind: input, shape index: {}]   ;;  %s1910_s5 = inlined_call_operand.hbm [shape: f32[63,63], index: 5, kind: input, shape index: {}]   ;;  %s1911_s6 = inlined_call_operand.vmem [shape: f32[1,63], index: 6, kind: input, shape index: {}]   ;;  %s1912_s7 = inlined_call_operand.hbm [shape: f32[64,64], index: 7, kind: input, shape index: {}]   ;;  %s1913_s8 = inlined_call_operand.vmem [shape: f32[2,2,16], index: 8, kind: input, shape index: {}]   ;;  %s1914_s9 = inlined_call_operand.vmem [shape: f32[2,16], index: 9, kind: input, shape index: {}]   ;;  %s1915_s10 = inlined_call_operand.hbm [shape: f32[2,2,64], index: 10, kind: output, shape index: {0}]   ;;  %s1916_s11 = inlined_call_operand.hbm [shape: f32[2,128], index: 11, kind: output, shape index: {1}]  }
   0x1   :  { %18 = vsyncpa [#allocation6], 0 }
   0x2   :  { %19 = vsyncpa [#allocation9], 0 }
   0x3   :  { %20 = vsyncpa [#allocation12], 0 }
   0x4   :  { %21 = vsyncpa [#allocation4], 0 }
   0x5   :  { %22 = vsyncpa [#allocation15], 0  ;;  %s1460_s17 = smov [#allocation5]  }
   0x6   :  { %s38_s18 = sshll.u32 %s1460_s17, 4  ;;  %s39_s18 = int_to_ptr.vmem [resolvable:$true] %s38_s18 }
   0x7   :  { %s1296_s19 = scalar_lea.vmem %s39_s18, 512  ;;  %p1301_p1 = scmp.lt.s32.totalorder %s39_s18, %s39_s18 }
   0x8   :  { %p1297_p0 = scmp.ne.s32.totalorder %s39_s18, %s1296_s19  ;;  %p1302_p2 = scmp.lt.s32.totalorder %s1296_s19, %s1296_s19 }
   0xa   :  { %p1303_p3 = por %p1302_p2, %p1301_p1 }
   0xc   :  { %p1304_p4 = pnand %p1303_p3, %p1297_p0 }
   0xe   :  { %1307 = shalt.err (!%p1304_p4)
}
   0xf   :  { %s1461_s20 = smov 128   ;;  %s1462_s21 = smov 8  }
  0x10   :  { %44 = dma.hbm_to_vmem [thread:$0]  %s1906_s1, 512, %s39_s18, [#allocation6], %s1461_s20, %s1461_s20, %s1462_s21  }
  0x11   :  { %s1463_s24 = smov [#allocation8]   ;;  %s1464_s26 = smov [#allocation2]  }
  0x12   :  { %s65_s25 = sshll.u32 %s1463_s24, 4  ;;  %s29_s27 = sshll.u32 %s1464_s26, 4  ;;  %s66_s25 = int_to_ptr.vmem [resolvable:$true] %s65_s25  ;;  %s30_s27 = int_to_ptr.vmem [resolvable:$true] %s29_s27 }
  0x13   :  { %s1316_s28 = scalar_lea.vmem %s66_s25, 16  ;;  %s1320_s29 = scalar_lea.vmem %s66_s25, 32 }
  0x14   :  { %p1317_p5 = scmp.ne.s32.totalorder %s66_s25, %s1316_s28  ;;  %p1321_p6 = scmp.lt.s32.totalorder %s66_s25, %s66_s25 }
  0x15   :  { %p1322_p7 = scmp.lt.s32.totalorder %s1320_s29, %s1316_s28 }
  0x17   :  { %p1323_p8 = por %p1322_p7, %p1321_p6 }
  0x19   :  { %p1324_p9 = pnand %p1323_p8, %p1317_p5 }
  0x1b   :  { %1327 = shalt.err (!%p1324_p9)
}
  0x1c   :  { %68 = dma.hbm_to_vmem [thread:$0]  %s1909_s4, 16, %s66_s25, [#allocation9]  }
  0x1d   :  { %s1336_s13 = scalar_lea.vmem %s30_s27, 32  ;;  %p1341_p11 = scmp.lt.s32.totalorder %s30_s27, %s30_s27 }
  0x1e   :  { %p1337_p10 = scmp.ne.s32.totalorder %s30_s27, %s1336_s13  ;;  %p1342_p12 = scmp.lt.s32.totalorder %s1336_s13, %s1336_s13 }
  0x20   :  { %p1343_p13 = por %p1342_p12, %p1341_p11 }
  0x22   :  { %p1344_p0 = pnand %p1343_p13, %p1337_p10 }
  0x24   :  { %1347 = shalt.err (!%p1344_p0)
}
  0x25   :  { %32 = dma.hbm_to_vmem [thread:$0]  %s1905_s0, 32, %s30_s27, [#allocation3]  }
  0x26   :  { %s1465_s15 = smov [#allocation7]   ;;  %s1466_s17 = smov [#allocation10]  }
  0x27   :  { %s52_s16 = sshll.u32 %s1465_s15, 4  ;;  %s74_s18 = sshll.u32 %s1466_s17, 4  ;;  %s53_s16 = int_to_ptr.vmem [resolvable:$true] %s52_s16  ;;  %s75_s18 = int_to_ptr.vmem [resolvable:$true] %s74_s18 }
  0x28   :  { %s1356_s19 = scalar_lea.vmem %s53_s16, 1024  ;;  %p1361_p2 = scmp.lt.s32.totalorder %s53_s16, %s53_s16 }
  0x29   :  { %p1357_p1 = scmp.ne.s32.totalorder %s53_s16, %s1356_s19  ;;  %p1362_p3 = scmp.lt.s32.totalorder %s1356_s19, %s1356_s19 }
  0x2b   :  { %p1363_p4 = por %p1362_p3, %p1361_p2 }
  0x2d   :  { %p1364_p5 = pnand %p1363_p4, %p1357_p1 }
  0x2f   :  { %1367 = shalt.err (!%p1364_p5)
}
  0x30   :  { %58 = dma.hbm_to_vmem [thread:$0]  %s1908_s3, 1024, %s53_s16, [#allocation6], %s1461_s20, %s1461_s20, %s1462_s21  }
  0x31   :  { %s1376_s0 = scalar_lea.vmem %s75_s18, 1024  ;;  %p1381_p7 = scmp.lt.s32.totalorder %s75_s18, %s75_s18 }
  0x32   :  { %p1377_p6 = scmp.ne.s32.totalorder %s75_s18, %s1376_s0  ;;  %p1382_p8 = scmp.lt.s32.totalorder %s1376_s0, %s1376_s0 }
  0x34   :  { %p1383_p9 = por %p1382_p8, %p1381_p7 }
  0x36   :  { %p1384_p10 = pnand %p1383_p9, %p1377_p6 }
  0x38   :  { %1387 = shalt.err (!%p1384_p10)
}
  0x39   :  { %80 = dma.hbm_to_vmem [thread:$0]  %s1910_s5, 1024, %s75_s18, [#allocation9], %s1461_s20, %s1461_s20, %s1462_s21  }
  0x3a   :  { %s1467_s25 = smov [#allocation11]  }
  0x3b   :  { %s88_s26 = sshll.u32 %s1467_s25, 4  ;;  %s89_s26 = int_to_ptr.vmem [resolvable:$true] %s88_s26 }
  0x3c   :  { %s1396_s27 = scalar_lea.vmem %s89_s26, 1024  ;;  %p1401_p12 = scmp.lt.s32.totalorder %s89_s26, %s89_s26 }
  0x3d   :  { %p1397_p11 = scmp.ne.s32.totalorder %s89_s26, %s1396_s27  ;;  %p1402_p13 = scmp.lt.s32.totalorder %s1396_s27, %s1396_s27 }
  0x3f   :  { %p1403_p0 = por %p1402_p13, %p1401_p12 }
  0x41   :  { %p1404_p1 = pnand %p1403_p0, %p1397_p11 }
  0x43   :  { %1407 = shalt.err (!%p1404_p1)
}
  0x44   :  { %94 = dma.hbm_to_vmem [thread:$0]  %s1912_s7, 1024, %s89_s26, [#allocation12], %s1461_s20, %s1461_s20, %s1462_s21  }
  0x45   :  { %1448 = dma.done.wait [#allocation3], 32  }
  0x46   :  { %1449 = vsyncadd [#allocation3], 4294967264 }
  0x47   :  { %1450 = dma.done.wait [#allocation6], 1536  }
  0x48   :  { %1451 = vsyncadd [#allocation6], 4294965760 }
  0x49   :  { %1452 = dma.done.wait [#allocation9], 1040  }
  0x4a   :  { %1453 = vsyncadd [#allocation9], 4294966256 }
  0x4b   :  { %1454 = dma.done.wait [#allocation12], 1024  }
  0x4c   :  { %1455 = vsyncadd [#allocation12], 4294966272  ;;  %v1468_v0 = vmov 0.0   ;;  %vm1469_vm0 = vmmov 0   ;;  %v121_v1 = vld [vmem:[#allocation5 + $0x18] sm:$0xff]  ;;  %v120_v2 = vld [vmem:[#allocation5 + $0x10] sm:$0xff] }
  0x4d   :  { %1174 = vmatprep.subr.mxu0 %v1468_v0  ;;  %1182 = vmatprep.mubr.msk.f32.mxu0 %vm1469_vm0, %v1468_v0  ;;  %v119_v3 = vld [vmem:[#allocation5 + $0x8] sm:$0xff]  ;;  %v118_v4 = vld [vmem:[#allocation5] sm:$0xff]  ;;  %v117_v5 = vld [vmem:[#allocation2] sm:$0x3]  ;;  %vm129_vm1 = vcmask 261120   ;;  %vm203_vm2 = vcmask 508928  }
  0x4e   :  { %1185 = vmatprep.subr.mxu1 %v1468_v0  ;;  %1201 = vmatprep.mubr.msk.f32.mxu1 %vm1469_vm0, %v1468_v0  ;;  %v1112_v6 = vld [vmem:[%s1907_s2] ss:$0 sm:$0xff]  ;;  %vm235_vm3 = vcmask 1046528   ;;  %v222_v17 = vld [vmem:[#allocation7 + $0x30] sm:$0xff]  ;;  %v221_v18 = vld [vmem:[#allocation7 + $0x28] sm:$0xff]  ;;  %vm231_vm4 = vcmask 515072  }
  0x4f   :  { %1175 = vmatpush3.msra.mxu0 %v121_v1  ;;  %v223_v16 = vld [vmem:[#allocation7 + $0x38] sm:$0x7f]  ;;  %v220_v19 = vld [vmem:[#allocation7 + $0x20] sm:$0xff]  ;;  %v218_v21 = vld [vmem:[#allocation7 + $0x10] sm:$0xff]  ;;  %vm428_vm5 = vcmask 7168   ;;  %vm438_vm6 = vcmask 523264  }
  0x50   :  { %1176 = vmatprep.subr.mxu0 %v1468_v0  ;;  %1186 = vmatpush3.msk.msra.mxu1 %vm235_vm3, %v223_v16  ;;  %v219_v20 = vld [vmem:[#allocation7 + $0x18] sm:$0xff]  ;;  %v217_v22 = vld [vmem:[#allocation7 + $0x8] sm:$0xff]  ;;  %v216_v23 = vld [vmem:[#allocation7] sm:$0xff]  ;;  %s1471_s21 = smov 64  }
  0x51   :  { %1177 = vmatpush3.msra.mxu0 %v120_v2  ;;  %1187 = vmatprep.subr.mxu1 %v1468_v0  ;;  %v1114_v27 = vld [vmem:[#allocation8] ss:$0 sm:$0xff]  ;;  %v327_v38 = vld [vmem:[#allocation10 + $0x30] sm:$0xff]  ;;  %v326_v39 = vld [vmem:[#allocation10 + $0x28] sm:$0xff] }
  0x52   :  { %1178 = vmatprep.subr.mxu0 %v1468_v0  ;;  %1188 = vmatpush3.msra.mxu1 %v222_v17  ;;  %v328_v37 = vld [vmem:[#allocation10 + $0x38] sm:$0x7f]  ;;  %v325_v40 = vld [vmem:[#allocation10 + $0x20] sm:$0xff]  ;;  %v323_v42 = vld [vmem:[#allocation10 + $0x10] sm:$0xff] }
  0x53   :  { %1179 = vmatpush3.msra.mxu0 %v119_v3  ;;  %1189 = vmatprep.subr.mxu1 %v1468_v0  ;;  %v324_v41 = vld [vmem:[#allocation10 + $0x18] sm:$0xff]  ;;  %v322_v43 = vld [vmem:[#allocation10 + $0x8] sm:$0xff]  ;;  %v321_v44 = vld [vmem:[#allocation10] sm:$0xff] }
  0x54   :  { %1180 = vmatprep.subr.mxu0 %v1468_v0  ;;  %1190 = vmatpush3.msra.mxu1 %v221_v18  ;;  %v1117_v48 = vld [vmem:[%s1911_s6] ss:$0 sm:$0xff]  ;;  %v436_v59 = vld [vmem:[#allocation11 + $0x30] sm:$0xff]  ;;  %v435_v60 = vld [vmem:[#allocation11 + $0x28] sm:$0xff]  ;;  %s1470_s6 = smov 1  }
  0x55   :  { %1181 = vmatpush3.msra.mxu0 %v118_v4  ;;  %1191 = vmatprep.subr.mxu1 %v1468_v0  ;;  %v437_v58 = vld [vmem:[#allocation11 + $0x38] sm:$0xff]  ;;  %v434_v61 = vld [vmem:[#allocation11 + $0x20] sm:$0xff]  ;;  %v432_v63 = vld [vmem:[#allocation11 + $0x10] sm:$0xff] }
  0x56   :  { %1183 = vmatmul.mubr.msk.f32.vlgmr.msra.gmra.mxu0 %vm129_vm1, %v117_v5  ;;  %1204 = vmatprep.subr.mxu0 %v1468_v0  ;;  %v433_v62 = vld [vmem:[#allocation11 + $0x18] sm:$0xff]  ;;  %v431_v1 = vld [vmem:[#allocation11 + $0x8] sm:$0xff]  ;;  %v430_v3 = vld [vmem:[#allocation11] sm:$0xff]  ;;  %vm825_vm1 = vcmask 1041408  }
  0x57   :  { %1220 = vmatprep.mubr.msk.f32.mxu0 %vm1469_vm0, %v1468_v0  ;;  %1192 = vmatpush3.msra.mxu1 %v220_v19  ;;  %v843_v19 = vld [vmem:[%s1913_s8] sm:$0x3] }
  0x58   :  { %1193 = vmatprep.subr.mxu1 %v1468_v0  ;;  %1205 = vmatpush3.msk.msra.mxu0 %vm235_vm3, %v328_v37 }
  0x59   :  { %1194 = vmatpush3.msra.mxu1 %v219_v20  ;;  %1206 = vmatprep.subr.mxu0 %v1468_v0 }
  0x5a   :  { %1195 = vmatprep.subr.mxu1 %v1468_v0  ;;  %1207 = vmatpush3.msra.mxu0 %v327_v38 }
  0x5b   :  { %1196 = vmatpush3.msra.mxu1 %v218_v21  ;;  %1208 = vmatprep.subr.mxu0 %v1468_v0 }
  0x5c   :  { %1197 = vmatprep.subr.mxu1 %v1468_v0  ;;  %1209 = vmatpush3.msra.mxu0 %v326_v39 }
  0x5d   :  { %1198 = vmatpush3.msra.mxu1 %v217_v22  ;;  %1210 = vmatprep.subr.mxu0 %v1468_v0 }
  0x5e   :  { %1199 = vmatprep.subr.mxu1 %v1468_v0  ;;  %1211 = vmatpush3.msra.mxu0 %v325_v40 }
  0x5f   :  { %1200 = vmatpush3.msra.mxu1 %v216_v23  ;;  %1212 = vmatprep.subr.mxu0 %v1468_v0 }
  0x60   :  { %1223 = vmatprep.subr.mxu1 %v1468_v0  ;;  %1213 = vmatpush3.msra.mxu0 %v324_v41 }
  0x61   :  { %1214 = vmatprep.subr.mxu0 %v1468_v0 }
  0x62   :  { %1215 = vmatpush3.msra.mxu0 %v323_v42 }
  0x63   :  { %1216 = vmatprep.subr.mxu0 %v1468_v0 }
  0x64   :  { %1217 = vmatpush3.msra.mxu0 %v322_v43 }
  0x65   :  { %1218 = vmatprep.subr.mxu0 %v1468_v0 }
  0x66   :  { %1219 = vmatpush3.msra.mxu0 %v321_v44 }
  0x67   :  { %1242 = vmatprep.subr.mxu0 %v1468_v0 }
 0x116   :  { %v199_v7 = vpop.f32.mrf.mxu0 }
 0x117   :  { %v200_v8 = vadd.f32 %v1112_v6, %v199_v7 }
 0x118   :  { %v1184_v9 = vpop.f32.mrf.mxu0 }
 0x119   :  { %v204_v10 = vsel %vm203_vm2, %v200_v8, -inf }
 0x11a   :  { %205 = vmax.xlane.f32.xlu0 %v204_v10 }
 0x1a3   :  { %v206_v11 = vpop.xlane.xlu0 %205 }
 0x1a4   :  { %v207_v12 = vsub.f32 %v200_v8, %v206_v11  ;;  %v844_v8 = vlaneseq }
 0x1a6   :  { %v208_v13 = vmul.f32 1.442695, %v207_v12  ;;  %v845_v9 = vshrl.u32 %v844_v8, 7  ;;  %v1627_v12 = vld [vmem:[%s1914_s9] sm:$0x3] }
 0x1a8   :  { %1272 = vpow2.f32 %v208_v13  ;;  %v1622_v10 = vsub.s32 0, %v845_v9  ;;  %v985_v17 = vsub.s32 1, %v845_v9 }
 0x1aa   :  { %v847_v16 = vrot.slane %v1627_v12, %v1622_v10 }
 0x1b5   :  { %v1273_v14 = vpop.eup %1272 }
 0x1b6   :  { %v210_v15 = vsel %vm203_vm2, %v1273_v14, 0.0 }
 0x1b7   :  { %211 = vadd.xlane.f32.xlu0 %v210_v15 }
 0x240   :  { %v212_v24 = vpop.xlane.xlu0 %211 }
 0x241   :  { %1274 = vrcp.f32 %v212_v24 }
 0x24e   :  { %v1275_v25 = vpop.eup %1274 }
 0x24f   :  { %v215_v26 = vmul.f32 %v1275_v25, %v1273_v14  ;;  %v1649_v25 = vmul.f32 %v847_v16, %v843_v19 }
 0x251   :  { %1202 = vmatmul.mubr.msk.f32.vlgmr.msra.gmra.mxu1 %vm231_vm4, %v215_v26  ;;  %v1652_v26 = vrot.slane %v1627_v12, %v985_v17 }
 0x252   :  { %1239 = vmatprep.mubr.msk.f32.mxu1 %vm1469_vm0, %v1468_v0  ;;  %1224 = vmatpush3.msra.mxu1 %v437_v58 }
 0x253   :  { %1225 = vmatprep.subr.mxu1 %v1468_v0 }
 0x254   :  { %1226 = vmatpush3.msra.mxu1 %v436_v59 }
 0x255   :  { %1227 = vmatprep.subr.mxu1 %v1468_v0 }
 0x256   :  { %1228 = vmatpush3.msra.mxu1 %v435_v60 }
 0x257   :  { %1229 = vmatprep.subr.mxu1 %v1468_v0 }
 0x258   :  { %1230 = vmatpush3.msra.mxu1 %v434_v61 }
 0x259   :  { %1231 = vmatprep.subr.mxu1 %v1468_v0 }
 0x25a   :  { %1232 = vmatpush3.msra.mxu1 %v433_v62 }
 0x25b   :  { %1233 = vmatprep.subr.mxu1 %v1468_v0 }
 0x25c   :  { %1234 = vmatpush3.msra.mxu1 %v432_v63 }
 0x25d   :  { %1235 = vmatprep.subr.mxu1 %v1468_v0 }
 0x25e   :  { %1236 = vmatpush3.msra.mxu1 %v431_v1 }
 0x25f   :  { %1237 = vmatprep.subr.mxu1 %v1468_v0 }
 0x260   :  { %1238 = vmatpush3.msra.mxu1 %v430_v3 }
 0x311   :  { %v305_v28 = vpop.f32.mrf.mxu1 }
 0x312   :  { %v306_v29 = vadd.f32 %v1114_v27, %v305_v28 }
 0x313   :  { %v1203_v30 = vpop.f32.mrf.mxu1 }
 0x314   :  { %v309_v31 = vsel %vm203_vm2, %v306_v29, -inf }
 0x315   :  { %310 = vmax.xlane.f32.xlu1 %v309_v31 }
 0x39e   :  { %v311_v32 = vpop.xlane.xlu1 %310 }
 0x39f   :  { %v312_v33 = vsub.f32 %v306_v29, %v311_v32 }
 0x3a1   :  { %v313_v34 = vmul.f32 1.442695, %v312_v33 }
 0x3a3   :  { %1276 = vpow2.f32 %v313_v34 }
 0x3b0   :  { %v1277_v35 = vpop.eup %1276 }
 0x3b1   :  { %v315_v36 = vsel %vm203_vm2, %v1277_v35, 0.0 }
 0x3b2   :  { %316 = vadd.xlane.f32.xlu1 %v315_v36 }
 0x43b   :  { %v317_v45 = vpop.xlane.xlu1 %316 }
 0x43c   :  { %1278 = vrcp.f32 %v317_v45 }
 0x449   :  { %v1279_v46 = vpop.eup %1278 }
 0x44a   :  { %v320_v47 = vmul.f32 %v1279_v46, %v1277_v35 }
 0x44c   :  { %1221 = vmatmul.mubr.msk.f32.vlgmr.msra.gmra.mxu0 %vm231_vm4, %v320_v47  ;;  %vm827_vm4 = vcmask 1042432  }
 0x44d   :  { %1246 = vmatprep.mubr.msk.f32.mxu0 %vm1469_vm0, %v1468_v0 }
 0x50c   :  { %v408_v49 = vpop.f32.mrf.mxu0 }
 0x50d   :  { %v409_v50 = vadd.f32 %v1117_v48, %v408_v49 }
 0x50e   :  { %v1222_v51 = vpop.f32.mrf.mxu0 }
 0x50f   :  { %v412_v52 = vsel %vm203_vm2, %v409_v50, -inf }
 0x510   :  { %413 = vmax.xlane.f32.xlu0 %v412_v52 }
 0x599   :  { %v414_v53 = vpop.xlane.xlu0 %413 }
 0x59a   :  { %v415_v54 = vsub.f32 %v409_v50, %v414_v53 }
 0x59c   :  { %v416_v55 = vmul.f32 1.442695, %v415_v54 }
 0x59e   :  { %1280 = vpow2.f32 %v416_v55 }
 0x5ab   :  { %v1281_v56 = vpop.eup %1280 }
 0x5ac   :  { %v418_v57 = vsel %vm203_vm2, %v1281_v56, 0.0  ;;  %vm823_vm2 = vcmask 1040384  }
 0x5ad   :  { %419 = vadd.xlane.f32.xlu1 %v418_v57 }
 0x636   :  { %v420_v2 = vpop.xlane.xlu1 %419 }
 0x637   :  { %1282 = vrcp.f32 %v420_v2 }
 0x644   :  { %v1283_v4 = vpop.eup %1282 }
 0x645   :  { %v423_v5 = vmul.f32 %v1283_v4, %v1281_v56 }
 0x647   :  { %425 = vrot.lane.b32.xlu0 %v423_v5, %s1470_s6 }
 0x6b9   :  { %v426_v6 = vpop.permute.xlu0 %425 }
 0x6ba   :  { %v429_v7 = vsel %vm428_vm5, 0.0, %v426_v6  ;;  %vm829_vm5 = vcmask 1043456  }
 0x6bb   :  { %514 = vrot.lane.b32.xlu1 %v429_v7, %s1471_s21  ;;  %1240 = vmatmul.mubr.msk.f32.vlgmr.msra.gmra.mxu1 %vm438_vm6, %v429_v7 }
 0x72d   :  { %v515_v18 = vpop.permute.xlu1 %514 }
 0x77b   :  { %v508_v11 = vpop.f32.mrf.mxu1 }
 0x77c   :  { %v512_v13 = vmax.f32 %v508_v11, 0.0 }
 0x77d   :  { %v1241_v14 = vpop.f32.mrf.mxu1 }
 0x77e   :  { %v1629_v15 = vmin.f32 %v512_v13, 1.0 }
 0x780   :  { %v517_v20 = vsel %vm438_vm6, %v1629_v15, %v515_v18  ;;  %vm533_vm7 = vcmp.ge.f32.partialorder %v1629_v15, 0.3846154  ;;  %vm536_vm8 = vcmp.ge.f32.partialorder %v1629_v15, 0.46153846  ;;  %vm539_vm9 = vcmp.ge.f32.partialorder %v1629_v15, 0.53846157 }
 0x781   :  { %518 = vst [vmem:[#allocation14] sm:$0x3] %v517_v20  ;;  %v1642_v21 = vsel %vm533_vm7, 1.0, %v1468_v0  ;;  %v537_v22 = vsel %vm536_vm8, 1.0, %v1468_v0  ;;  %v540_v23 = vsel %vm539_vm9, 1.0, %v1468_v0  ;;  %vm557_vm15 = vcmp.ge.f32.partialorder %v1629_v15, 1.0 }
 0x782   :  { %vm542_vm10 = vcmp.ge.f32.partialorder %v1629_v15, 0.61538464  ;;  %vm545_vm11 = vcmp.ge.f32.partialorder %v1629_v15, 0.6923077  ;;  %v1655_v27 = vsub.f32 %v1642_v21, %v537_v22  ;;  %vm548_vm12 = vcmp.ge.f32.partialorder %v1629_v15, 0.7692308 }
 0x783   :  { %v543_v24 = vsel %vm542_vm10, 1.0, %v1468_v0  ;;  %v546_v28 = vsel %vm545_vm11, 1.0, %v1468_v0  ;;  %vm551_vm13 = vcmp.ge.f32.partialorder %v1629_v15, 0.84615386  ;;  %v541_v29 = vsub.f32 %v537_v22, %v540_v23 }
 0x784   :  { %v549_v30 = vsel %vm548_vm12, 1.0, %v1468_v0  ;;  %v552_v31 = vsel %vm551_vm13, 1.0, %v1468_v0  ;;  %vm554_vm14 = vcmp.ge.f32.partialorder %v1629_v15, 0.9230769  ;;  %v544_v32 = vsub.f32 %v540_v23, %v543_v24 }
 0x785   :  { %v547_v33 = vsub.f32 %v543_v24, %v546_v28  ;;  %v555_v34 = vsel %vm554_vm14, 1.0, %v1468_v0  ;;  %v550_v35 = vsub.f32 %v546_v28, %v549_v30  ;;  %v558_v36 = vsel %vm557_vm15, 1.0, %v1468_v0 }
 0x786   :  { %v1667_v37 = vadd.f32 -0.3846154, %v1629_v15  ;;  %v1670_v38 = vsub.f32 0.53846157, %v1629_v15  ;;  %v553_v39 = vsub.f32 %v549_v30, %v552_v31  ;;  %v1673_v40 = vadd.f32 -0.46153846, %v1629_v15 }
 0x787   :  { %v1676_v41 = vsub.f32 0.61538464, %v1629_v15  ;;  %v1679_v42 = vadd.f32 -0.53846157, %v1629_v15  ;;  %v556_v43 = vsub.f32 %v552_v31, %v555_v34  ;;  %v1684_v46 = vsub.f32 0.6923077, %v1629_v15 }
 0x788   :  { %v598_v44 = vmul.f32 12.999985, %v1667_v37  ;;  %v601_v45 = vmul.f32 12.999979, %v1670_v38  ;;  %v559_v47 = vsub.f32 %v555_v34, %v558_v36  ;;  %v605_v48 = vmul.f32 12.999979, %v1673_v40 }
 0x789   :  { %v608_v49 = vmul.f32 12.999985, %v1676_v41  ;;  %v612_v50 = vmul.f32 12.999985, %v1679_v42  ;;  %v615_v53 = vmul.f32 12.999985, %v1684_v46 }
 0x78a   :  { %v599_v51 = vmul.f32 %v598_v44, %v1655_v27  ;;  %v602_v52 = vmul.f32 %v601_v45, %v541_v29  ;;  %v1692_v54 = vadd.f32 -0.61538464, %v1629_v15  ;;  %v606_v55 = vmul.f32 %v605_v48, %v541_v29 }
 0x78b   :  { %v609_v56 = vmul.f32 %v608_v49, %v544_v32  ;;  %v613_v57 = vmul.f32 %v612_v50, %v544_v32  ;;  %v1695_v58 = vsub.f32 0.7692308, %v1629_v15  ;;  %v616_v60 = vmul.f32 %v615_v53, %v547_v33 }
 0x78c   :  { %v1697_v59 = vadd.f32 %v602_v52, %v599_v51  ;;  %v619_v61 = vmul.f32 12.999985, %v1692_v54  ;;  %v1701_v62 = vadd.f32 -0.6923077, %v1629_v15  ;;  %v1705_v2 = vsub.f32 0.84615386, %v1629_v15 }
 0x78d   :  { %v610_v63 = vadd.f32 %v609_v56, %v606_v55  ;;  %v622_v1 = vmul.f32 12.999985, %v1695_v58  ;;  %v1708_v3 = vadd.f32 -0.7692308, %v1629_v15  ;;  %v617_v4 = vadd.f32 %v616_v60, %v613_v57 }
 0x78e   :  { %v620_v5 = vmul.f32 %v619_v61, %v547_v33  ;;  %v626_v6 = vmul.f32 12.999985, %v1701_v62  ;;  %v1712_v7 = vsub.f32 0.9230769, %v1629_v15  ;;  %v629_v9 = vmul.f32 12.999985, %v1705_v2 }
 0x78f   :  { %v623_v8 = vmul.f32 %v622_v1, %v550_v35  ;;  %v633_v11 = vmul.f32 12.999985, %v1708_v3  ;;  %v1131_v13 = vadd.f32 -0.84615386, %v1629_v15  ;;  %v1719_v17 = vsub.f32 1.0, %v1629_v15 }
 0x790   :  { %v627_v14 = vmul.f32 %v626_v6, %v550_v35  ;;  %v636_v16 = vmul.f32 12.999985, %v1712_v7  ;;  %v1132_v18 = vadd.f32 -0.9230769, %v1629_v15  ;;  %v630_v20 = vmul.f32 %v629_v9, %v553_v39 }
 0x791   :  { %v624_v19 = vadd.f32 %v623_v8, %v620_v5  ;;  %v634_v22 = vmul.f32 %v633_v11, %v553_v39  ;;  %v640_v23 = vmul.f32 12.999985, %v1131_v13  ;;  %v1723_v28 = vmul.f32 12.999985, %v1719_v17 }
 0x792   :  { %v637_v24 = vmul.f32 %v636_v16, %v556_v43  ;;  %v1725_v29 = vmul.f32 12.999985, %v1132_v18  ;;  %v679_v30 = vmul.f32 6.4999948, %v1667_v37  ;;  %v631_v31 = vadd.f32 %v630_v20, %v627_v14 }
 0x793   :  { %v641_v32 = vmul.f32 %v640_v23, %v556_v43  ;;  %v681_v33 = vmul.f32 6.4999948, %v1676_v41  ;;  %v684_v34 = vmul.f32 6.4999948, %v1673_v40  ;;  %v644_v36 = vmul.f32 %v1723_v28, %v559_v47 }
 0x794   :  { %v638_v35 = vadd.f32 %v637_v24, %v634_v22  ;;  %v648_v39 = vmul.f32 %v1725_v29, %v559_v47  ;;  %v680_v44 = vmul.f32 %v679_v30, %v1697_v59  ;;  %v686_v49 = vmul.f32 6.499996, %v1684_v46 }
 0x795   :  { %v682_v45 = vmul.f32 %v681_v33, %v610_v63  ;;  %v685_v48 = vmul.f32 %v684_v34, %v610_v63  ;;  %v689_v50 = vmul.f32 6.499996, %v1679_v42  ;;  %v645_v51 = vadd.f32 %v644_v36, %v641_v32 }
 0x796   :  { %v691_v43 = vmul.f32 6.499996, %v1695_v58  ;;  %v694_v52 = vmul.f32 6.499996, %v1692_v54  ;;  %v696_v53 = vmul.f32 6.499996, %v1705_v2  ;;  %v687_v56 = vmul.f32 %v686_v49, %v617_v4 }
 0x797   :  { %v1738_v55 = vadd.f32 %v682_v45, %v680_v44  ;;  %v690_v57 = vmul.f32 %v689_v50, %v617_v4  ;;  %v699_v47 = vmul.f32 6.499996, %v1701_v62  ;;  %v701_v1 = vmul.f32 6.499996, %v1712_v7 }
 0x798   :  { %v692_v60 = vmul.f32 %v691_v43, %v624_v19  ;;  %v695_v61 = vmul.f32 %v694_v52, %v624_v19  ;;  %v697_v63 = vmul.f32 %v696_v53, %v631_v31  ;;  %v688_v5 = vadd.f32 %v687_v56, %v685_v48 }
 0x799   :  { %v700_v6 = vmul.f32 %v699_v47, %v631_v31  ;;  %v704_v8 = vmul.f32 6.499996, %v1708_v3  ;;  %v706_v9 = vmul.f32 6.499996, %v1719_v17  ;;  %v702_v16 = vmul.f32 %v701_v1, %v638_v35 }
 0x79a   :  { %v693_v11 = vadd.f32 %v692_v60, %v690_v57  ;;  %v698_v14 = vadd.f32 %v697_v63, %v695_v61  ;;  %v709_v18 = vmul.f32 6.499996, %v1131_v13  ;;  %v711_v4 = vmul.f32 %v648_v39, %v1723_v28 }
 0x79b   :  { %v705_v20 = vmul.f32 %v704_v8, %v638_v35  ;;  %v707_v22 = vmul.f32 %v706_v9, %v645_v51  ;;  %v713_v23 = vmul.f32 %v648_v39, %v1725_v29  ;;  %v703_v19 = vadd.f32 %v702_v16, %v700_v6 }
 0x79c   :  { %v710_v24 = vmul.f32 %v709_v18, %v645_v51  ;;  %v747_v30 = vmul.f32 4.333331, %v1667_v37  ;;  %v749_v31 = vmul.f32 4.333331, %v1684_v46  ;;  %v752_v33 = vmul.f32 4.333331, %v1673_v40 }
 0x79d   :  { %v708_v32 = vadd.f32 %v707_v22, %v705_v20  ;;  %v754_v34 = vmul.f32 4.3333316, %v1695_v58  ;;  %v757_v13 = vmul.f32 4.3333316, %v1679_v42  ;;  %v759_v44 = vmul.f32 4.3333316, %v1705_v2 }
 0x79e   :  { %v712_v35 = vadd.f32 %v711_v4, %v710_v24  ;;  %v748_v36 = vmul.f32 %v747_v30, %v1738_v55  ;;  %v750_v39 = vmul.f32 %v749_v31, %v688_v5  ;;  %v753_v37 = vmul.f32 %v752_v33, %v688_v5 }
 0x79f   :  { %v755_v45 = vmul.f32 %v754_v34, %v693_v11  ;;  %v758_v46 = vmul.f32 %v757_v13, %v693_v11  ;;  %v762_v48 = vmul.f32 4.3333316, %v1692_v54  ;;  %vm831_vm6 = vcmask 1044480  }
 0x7a0   :  { %v1754_v40 = vadd.f32 %v750_v39, %v748_v36  ;;  %v760_v58 = vmul.f32 %v759_v44, %v698_v14  ;;  %v764_v42 = vmul.f32 4.3333316, %v1712_v7  ;;  %v767_v49 = vmul.f32 4.3333316, %v1701_v62 }
 0x7a1   :  { %vm833_vm7 = vcmask 1045504   ;;  %v1758_v50 = vadd.f32 %v755_v45, %v753_v37  ;;  %v763_v51 = vmul.f32 %v762_v48, %v698_v14  ;;  %v769_v2 = vmul.f32 4.3333316, %v1719_v17 }
 0x7a2   :  { %v772_v43 = vmul.f32 4.3333316, %v1708_v3  ;;  %v1762_v52 = vadd.f32 %v760_v58, %v758_v46  ;;  %v765_v53 = vmul.f32 %v764_v42, %v703_v19  ;;  %v768_v54 = vmul.f32 %v767_v49, %v703_v19 }
 0x7a3   :  { %v774_v56 = vmul.f32 %v712_v35, %v706_v9  ;;  %v770_v57 = vmul.f32 %v769_v2, %v708_v32  ;;  %v776_v60 = vmul.f32 %v712_v35, %v709_v18  ;;  %v777_v7 = vmul.f32 %v713_v23, %v1723_v28 }
 0x7a4   :  { %v773_v47 = vmul.f32 %v772_v43, %v708_v32  ;;  %v1765_v61 = vadd.f32 %v765_v53, %v763_v51  ;;  %v1768_v62 = vmul.f32 %v713_v23, %v1725_v29  ;;  %v803_v63 = vrot.slane %v1758_v50, 7 }
 0x7a5   :  { %v806_v17 = vrot.slane %v1762_v52, 6  ;;  %v1772_v3 = vadd.f32 %v770_v57, %v768_v54  ;;  %v1776_v5 = vadd.f32 %v777_v7, %v776_v60  ;;  %vm519_vm8 = vcmp.ge.f32.partialorder %v1629_v15, 0.0 }
 0x7a6   :  { %v1774_v1 = vadd.f32 %v774_v56, %v773_v47  ;;  %v809_v6 = vrot.slane %v1765_v61, 5  ;;  %v821_v28 = vrot.slane %v1768_v62, 1  ;;  %v836_v29 = vsel %vm823_vm2, %v1754_v40, %v803_v63 }
 0x7a7   :  { %v850_v8 = vrot.slane %v1649_v25, 7  ;;  %v812_v9 = vrot.slane %v1772_v3, 4  ;;  %v837_v14 = vsel %vm825_vm1, %v836_v29, %v806_v17  ;;  %v520_v16 = vsel %vm519_vm8, 1.0, %v1468_v0 }
 0x7a8   :  { %v815_v11 = vrot.slane %v1774_v1, 3  ;;  %v838_v18 = vsel %vm827_vm4, %v837_v14, %v809_v6  ;;  %vm521_vm9 = vcmp.ge.f32.partialorder %v1629_v15, 0.07692308  ;;  %vm524_vm10 = vcmp.ge.f32.partialorder %v1629_v15, 0.15384616 }
 0x7a9   :  { %vm527_vm11 = vcmp.ge.f32.partialorder %v1629_v15, 0.23076923  ;;  %v818_v20 = vrot.slane %v1776_v5, 2  ;;  %v839_v22 = vsel %vm829_vm5, %v838_v18, %v812_v9  ;;  %v522_v4 = vsel %vm521_vm9, 1.0, %v1468_v0 }
 0x7aa   :  { %v525_v23 = vsel %vm524_vm10, 1.0, %v1468_v0  ;;  %v840_v19 = vsel %vm831_vm6, %v839_v22, %v815_v11  ;;  %v523_v24 = vsub.f32 %v520_v16, %v522_v4  ;;  %v528_v31 = vsel %vm527_vm11, 1.0, %v1468_v0 }
 0x7ab   :  { %v526_v30 = vsub.f32 %v522_v4, %v525_v23  ;;  %v841_v32 = vsel %vm833_vm7, %v840_v19, %v818_v20  ;;  %vm530_vm12 = vcmp.ge.f32.partialorder %v1629_v15, 0.30769232  ;;  %v560_v33 = vsub.f32 0.07692308, %v1629_v15 }
 0x7ac   :  { %v1802_v34 = vmul.f32 12.999983, %v1629_v15  ;;  %v842_v13 = vsel %vm235_vm3, %v841_v32, %v821_v28  ;;  %v531_v35 = vsel %vm530_vm12, 1.0, %v1468_v0  ;;  %v565_v36 = vsub.f32 0.15384616, %v1629_v15 }
 0x7ad   :  { %v1808_v39 = vadd.f32 -0.07692308, %v1629_v15  ;;  %1243 = vmatpush3.msra.mxu0 %v842_v13  ;;  %v529_v44 = vsub.f32 %v525_v23, %v528_v31  ;;  %v532_v37 = vsub.f32 %v528_v31, %v531_v35  ;;  %v535_v45 = vsub.f32 %v531_v35, %v1642_v21 }
 0x7ae   :  { %v561_v46 = vmul.f32 12.999983, %v560_v33  ;;  %1244 = vmatprep.subr.mxu0 %v1468_v0  ;;  %v564_v48 = vmul.f32 %v1802_v34, %v523_v24  ;;  %v566_v58 = vmul.f32 12.999983, %v565_v36  ;;  %v572_v49 = vsub.f32 0.23076923, %v1629_v15 }
 0x7af   :  { %v570_v42 = vmul.f32 12.999983, %v1808_v39  ;;  %v1816_v2 = vadd.f32 -0.15384616, %v1629_v15  ;;  %v579_v43 = vsub.f32 0.30769232, %v1629_v15 }
 0x7b0   :  { %v562_v51 = vmul.f32 %v561_v46, %v523_v24  ;;  %v1820_v53 = vadd.f32 -0.23076923, %v1629_v15  ;;  %v567_v21 = vmul.f32 %v566_v58, %v526_v30  ;;  %v573_v56 = vmul.f32 12.999985, %v572_v49 }
 0x7b1   :  { %v571_v54 = vmul.f32 %v570_v42, %v526_v30  ;;  %v586_v57 = vsub.f32 0.3846154, %v1629_v15  ;;  %v577_v47 = vmul.f32 12.999985, %v1816_v2  ;;  %v580_v60 = vmul.f32 12.999982, %v579_v43 }
 0x7b2   :  { %v584_v7 = vmul.f32 12.999982, %v1820_v53  ;;  %v649_v63 = vmul.f32 %v562_v51, %v561_v46  ;;  %v568_v17 = vadd.f32 %v567_v21, %v564_v48  ;;  %v574_v6 = vmul.f32 %v573_v56, %v529_v44 }
 0x7b3   :  { %v587_v28 = vmul.f32 12.999985, %v586_v57  ;;  %v1826_v29 = vadd.f32 -0.30769232, %v1629_v15  ;;  %v578_v9 = vmul.f32 %v577_v47, %v529_v44  ;;  %v581_v11 = vmul.f32 %v580_v60, %v532_v37 }
 0x7b4   :  { %v585_v14 = vmul.f32 %v584_v7, %v532_v37  ;;  %v593_v16 = vsub.f32 0.46153846, %v1629_v15  ;;  %v575_v18 = vadd.f32 %v574_v6, %v571_v54  ;;  %v650_v4 = vmul.f32 %v1802_v34, %v562_v51 }
 0x7b5   :  { %v588_v20 = vmul.f32 %v587_v28, %v535_v45  ;;  %v591_v22 = vmul.f32 12.999985, %v1826_v29  ;;  %v582_v23 = vadd.f32 %v581_v11, %v578_v9  ;;  %v651_v24 = vmul.f32 6.499995, %v565_v36 }
 0x7b6   :  { %v594_v19 = vmul.f32 12.999985, %v593_v16  ;;  %v654_v30 = vmul.f32 6.499995, %v1629_v15  ;;  %v656_v33 = vmul.f32 6.499996, %v572_v49 }
 0x7b7   :  { %v589_v31 = vadd.f32 %v588_v20, %v585_v14  ;;  %v592_v32 = vmul.f32 %v591_v22, %v535_v45  ;;  %v659_v13 = vmul.f32 6.499996, %v1808_v39  ;;  %v652_v44 = vmul.f32 %v651_v24, %v568_v17 }
 0x7b8   :  { %v595_v35 = vmul.f32 %v594_v19, %v1655_v27  ;;  %v655_v37 = vmul.f32 %v654_v30, %v568_v17  ;;  %v661_v48 = vmul.f32 6.499995, %v579_v43  ;;  %v657_v58 = vmul.f32 %v656_v33, %v575_v18 }
 0x7b9   :  { %v660_v42 = vmul.f32 %v659_v13, %v575_v18  ;;  %v664_v21 = vmul.f32 6.499995, %v1816_v2  ;;  %v666_v51 = vmul.f32 6.499995, %v586_v57  ;;  %v653_v56 = vadd.f32 %v652_v44, %v650_v4 }
 0x7ba   :  { %v596_v54 = vadd.f32 %v595_v35, %v592_v32  ;;  %v662_v36 = vmul.f32 %v661_v48, %v582_v23  ;;  %v669_v47 = vmul.f32 6.499995, %v1820_v53  ;;  %v658_v60 = vadd.f32 %v657_v58, %v655_v37 }
 0x7bb   :  { %v665_v45 = vmul.f32 %v664_v21, %v582_v23  ;;  %v667_v7 = vmul.f32 %v666_v51, %v589_v31  ;;  %v671_v6 = vmul.f32 6.499996, %v593_v16  ;;  %v674_v27 = vmul.f32 6.499996, %v1826_v29 }
 0x7bc   :  { %v663_v28 = vadd.f32 %v662_v36, %v660_v42  ;;  %v670_v9 = vmul.f32 %v669_v47, %v589_v31  ;;  %v676_v17 = vmul.f32 6.4999948, %v1670_v38  ;;  %v1838_v18 = vmul.f32 %v649_v63, %v561_v46 }
 0x7bd   :  { %v668_v11 = vadd.f32 %v667_v7, %v665_v45  ;;  %v672_v14 = vmul.f32 %v671_v6, %v596_v54  ;;  %v715_v20 = vmul.f32 %v649_v63, %v1802_v34  ;;  %v675_v22 = vmul.f32 %v674_v27, %v596_v54 }
 0x7be   :  { %v677_v4 = vmul.f32 %v676_v17, %v1697_v59  ;;  %v716_v19 = vmul.f32 %v653_v56, %v651_v24  ;;  %v718_v32 = vmul.f32 %v654_v30, %v653_v56  ;;  %v719_v33 = vmul.f32 4.3333316, %v572_v49 }
 0x7bf   :  { %v673_v23 = vadd.f32 %v672_v14, %v670_v9  ;;  %v722_v13 = vmul.f32 4.3333316, %v1629_v15  ;;  %v724_v31 = vmul.f32 4.333331, %v579_v43  ;;  %v727_v37 = vmul.f32 4.333331, %v1808_v39 }
 0x7c0   :  { %v678_v35 = vadd.f32 %v677_v4, %v675_v22  ;;  %v717_v44 = vadd.f32 %v716_v19, %v715_v20  ;;  %v729_v48 = vmul.f32 4.3333316, %v586_v57  ;;  %v720_v58 = vmul.f32 %v719_v33, %v658_v60 }
 0x7c1   :  { %v723_v46 = vmul.f32 %v722_v13, %v658_v60  ;;  %v725_v42 = vmul.f32 %v724_v31, %v663_v28  ;;  %v732_v34 = vmul.f32 4.3333316, %v1816_v2  ;;  %v728_v63 = vmul.f32 %v727_v37, %v663_v28 }
 0x7c2   :  { %v730_v21 = vmul.f32 %v729_v48, %v668_v11  ;;  %v734_v59 = vmul.f32 4.3333316, %v593_v16  ;;  %v737_v24 = vmul.f32 4.3333316, %v1820_v53  ;;  %v721_v30 = vadd.f32 %v720_v58, %v718_v32  ;;  %v1134_v16 = vld [vmem:[%s1913_s8 + $0x2] sm:$0x3] }
 0x7c3   :  { %v726_v49 = vadd.f32 %v725_v42, %v723_v46  ;;  %v733_v51 = vmul.f32 %v732_v34, %v668_v11  ;;  %v739_v15 = vmul.f32 4.333331, %v1670_v38  ;;  %v742_v39 = vmul.f32 4.333331, %v1826_v29  ;;  %s1472_s8 = smov [#allocation14]  }
 0x7c4   :  { %v731_v43 = vadd.f32 %v730_v21, %v728_v63  ;;  %v735_v54 = vmul.f32 %v734_v59, %v673_v23  ;;  %v738_v56 = vmul.f32 %v737_v24, %v673_v23  ;;  %v744_v36 = vmul.f32 4.333331, %v1676_v41  ;;  %s1096_s14 = sshll.u32 %s1472_s8, 4  ;;  %s1097_s14 = int_to_ptr.vmem [resolvable:$true] %s1096_s14 }
 0x7c5   :  { %v740_v57 = vmul.f32 %v739_v15, %v678_v35  ;;  %v782_v47 = vrot.slane %v717_v44, 7  ;;  %v785_v2 = vrot.slane %v721_v30, 6  ;;  %v743_v60 = vmul.f32 %v742_v39, %v678_v35  ;;  %s1408_s15 = scalar_lea.vmem %s1097_s14, 32  ;;  %p1413_p3 = scmp.lt.s32.totalorder %s1097_s14, %s1097_s14 }
 0x7c6   :  { %v736_v53 = vadd.f32 %v735_v54, %v733_v51  ;;  %v788_v45 = vrot.slane %v726_v49, 5  ;;  %vm853_vm13 = vcmask 130048   ;;  %v745_v38 = vmul.f32 %v744_v36, %v1738_v55  ;;  %p1409_p2 = scmp.ne.s32.totalorder %s1097_s14, %s1408_s15  ;;  %p1414_p4 = scmp.lt.s32.totalorder %s1408_s15, %s1408_s15 }
 0x7c7   :  { %v741_v7 = vadd.f32 %v740_v57, %v738_v56  ;;  %v824_v6 = vsel %vm823_vm2, %v1838_v18, %v782_v47  ;;  %v953_v29 = vrot.slane %v1754_v40, 1  ;;  %v791_v28 = vrot.slane %v731_v43, 4 }
 0x7c8   :  { %v826_v41 = vsel %vm825_vm1, %v824_v6, %v785_v2  ;;  %v955_v9 = vrot.slane %v1762_v52, 7  ;;  %v987_v27 = vmul.f32 %v1134_v16, %v1652_v26  ;;  %v746_v17 = vadd.f32 %v745_v38, %v743_v60  ;;  %p1415_p5 = por %p1414_p4, %p1413_p3 }
 0x7c9   :  { %v794_v11 = vrot.slane %v736_v53, 3  ;;  %v828_v14 = vsel %vm827_vm4, %v826_v41, %v788_v45  ;;  %v852_v55 = vsel %vm823_vm2, %v1627_v12, %v850_v8  ;;  %v797_v20 = vrot.slane %v741_v7, 2 }
 0x7ca   :  { %v830_v22 = vsel %vm829_vm5, %v828_v14, %v791_v28  ;;  %v957_v40 = vrot.slane %v1765_v61, 6  ;;  %v959_v4 = vrot.slane %v1772_v3, 5  ;;  %v800_v19 = vrot.slane %v746_v17, 1  ;;  %p1416_p6 = pnand %p1415_p5, %p1409_p2 }
 0x7cb   :  { %v832_v52 = vsel %vm831_vm6, %v830_v22, %v794_v11  ;;  %v974_v26 = vsel %vm823_vm2, %v953_v29, %v1758_v50  ;;  %v938_v32 = vrot.slane %v1838_v18, 1  ;;  %v940_v8 = vrot.slane %v721_v30, 7 }
 0x7cc   :  { %v834_v25 = vsel %vm833_vm7, %v832_v52, %v797_v20  ;;  %v975_v23 = vsel %vm825_vm1, %v974_v26, %v955_v9  ;;  %v942_v33 = vrot.slane %v726_v49, 6  ;;  %v961_v61 = vrot.slane %v1774_v1, 4 }
 0x7cd   :  { %v835_v13 = vsel %vm235_vm3, %v834_v25, %v800_v19  ;;  %v976_v3 = vsel %vm827_vm4, %v975_v23, %v957_v40  ;;  %v989_v31 = vrot.slane %v1627_v12, 1  ;;  %v963_v35 = vrot.slane %v1776_v5, 3 }
 0x7ce   :  { %1245 = vmatpush3.msra.mxu0 %v835_v13  ;;  %v977_v50 = vsel %vm829_vm5, %v976_v3, %v959_v4  ;;  %v967_v18 = vsel %vm823_vm2, %v938_v32, %v717_v44  ;;  %v992_v37 = vrot.slane %v987_v27, 7  ;;  %v965_v48 = vrot.slane %v1768_v62, 2 }
 0x7cf   :  { %1247 = vmatmul.mubr.msk.f32.vlgmr.msra.gmra.mxu0 %vm853_vm13, %v852_v55  ;;  %1249 = vmatprep.subr.mxu0 %v1468_v0  ;;  %v978_v1 = vsel %vm831_vm6, %v977_v50, %v961_v61  ;;  %v944_v58 = vrot.slane %v731_v43, 5  ;;  %v968_v46 = vsel %vm825_vm1, %v967_v18, %v940_v8  ;;  %v946_v42 = vrot.slane %v736_v53, 4 }
 0x7d0   :  { %v979_v12 = vsel %vm833_vm7, %v978_v1, %v963_v35  ;;  %v969_v5 = vsel %vm827_vm4, %v968_v46, %v942_v33  ;;  %1253 = vmatprep.mubr.msk.f32.mxu0 %vm1469_vm0, %v1468_v0  ;;  %v948_v34 = vrot.slane %v741_v7, 3  ;;  %v950_v62 = vrot.slane %v746_v17, 2 }
 0x7d1   :  { %v980_v44 = vsel %vm235_vm3, %v979_v12, %v965_v48  ;;  %v970_v63 = vsel %vm829_vm5, %v969_v5, %v944_v58  ;;  %v994_v24 = vsel %vm823_vm2, %v989_v31, %v992_v37 }
 0x7d2   :  { %1250 = vmatpush3.msra.mxu0 %v980_v44  ;;  %v971_v21 = vsel %vm831_vm6, %v970_v63, %v946_v42 }
 0x7d3   :  { %1251 = vmatprep.subr.mxu0 %v1468_v0  ;;  %v972_v59 = vsel %vm833_vm7, %v971_v21, %v948_v34 }
 0x7d4   :  { %v973_v30 = vsel %vm235_vm3, %v972_v59, %v950_v62 }
 0x7d5   :  { %1252 = vmatpush3.msra.mxu0 %v973_v30 }
 0x7d6   :  { %1254 = vmatmul.mubr.msk.f32.vlgmr.msra.gmra.mxu0 %vm853_vm13, %v994_v24 }
 0x7d7   :  { %1419 = shalt.err (!%p1416_p6)
}
 0x7d8   :  { %1099 = dma.vmem_to_hbm [thread:$0]  %s1097_s14, 32, %s1916_s11, [#allocation15]   ;;  %vm935_vm0 = vcmask 518145  }
 0x7d9   :  { %s1473_s18 = smov [#allocation13]  }
 0x7da   :  { %s1083_s19 = sshll.u32 %s1473_s18, 4  ;;  %s1084_s19 = int_to_ptr.vmem [resolvable:$true] %s1083_s19 }
 0x7db   :  { %s1428_s11 = scalar_lea.vmem %s1084_s19, 64  ;;  %p1433_p8 = scmp.lt.s32.totalorder %s1084_s19, %s1084_s19 }
 0x7dc   :  { %p1429_p7 = scmp.ne.s32.totalorder %s1084_s19, %s1428_s11  ;;  %p1434_p9 = scmp.lt.s32.totalorder %s1428_s11, %s1428_s11 }
 0x7de   :  { %p1435_p10 = por %p1434_p9, %p1433_p8 }
 0x7e0   :  { %p1436_p11 = pnand %p1435_p10, %p1429_p7 }
 0x88f   :  { %v923_v0 = vpop.f32.mrf.mxu0 }
 0x890   :  { %v927_v49 = vadd.f32 1e-07, %v923_v0 }
 0x891   :  { %v1248_v51 = vpop.f32.mrf.mxu0 }
 0x892   :  { %1284 = vrcp.f32 %v927_v49 }
 0x896   :  { %v1064_v15 = vpop.f32.mrf.mxu0 }
 0x897   :  { %v1068_v43 = vadd.f32 1e-07, %v1064_v15 }
 0x898   :  { %v1255_v54 = vpop.f32.mrf.mxu0 }
 0x899   :  { %1286 = vrcp.f32 %v1068_v43 }
 0x89f   :  { %v1285_v56 = vpop.eup %1284 }
 0x8a0   :  { %v933_v39 = vrot.slane %v1285_v56, %v1622_v10 }
 0x8a2   :  { %v934_v57 = vmul.f32 %v933_v39, %v923_v0 }
 0x8a4   :  { %936 = vst.msk [vmem:[#allocation13 - $0x1] sm:$0x6] %vm935_vm0, %v934_v57 }
 0x8a6   :  { %v1287_v36 = vpop.eup %1286 }
 0x8a7   :  { %v1074_v47 = vrot.slane %v1287_v36, %v1622_v10 }
 0x8a9   :  { %v1075_v2 = vmul.f32 %v1074_v47, %v1064_v15 }
 0x8ab   :  { %1077 = vst.msk [vmem:[#allocation13 + $0x1] sm:$0x6] %vm935_vm0, %v1075_v2 }
 0x8ac   :  { %1439 = shalt.err (!%p1436_p11)
}
 0x8ad   :  { %s1474_s4 = smov 32   ;;  %s1475_s22 = smov 2  }
 0x8ae   :  { %1089 = dma.vmem_to_hbm [thread:$0]  %s1084_s19, 64, %s1915_s10, [#allocation4], %s1474_s4, %s1474_s4, %s1475_s22  }
 0x8af   :  { %1456 = dma.done.wait [#allocation4], 64  }
 0x8b0   :  { %1457 = vsyncadd [#allocation4], 4294967232 }
 0x8b1   :  { %1458 = dma.done.wait [#allocation15], 32  }
 0x8b2   :  { %1459 = vsyncadd [#allocation15], 4294967264 }
 0x8b3   :  { %1106 = vsyncpa [#allocation3], 1 }
 0x8b4   :  { %1107 = vsyncpa [#allocation6], 1 }
 0x8b5   :  { %1108 = vsyncpa [#allocation9], 1 }
 0x8b6   :  { %1109 = vsyncpa [#allocation12], 1 }
 0x8b7   :  { %1110 = vsyncpa [#allocation4], 1 }
 0x8b8   :  { %1111 = vsyncpa [#allocation15], 1 }

</bundles_post_ra>
